<compile_context>
chip_gen: v7x
topology: tpu7x:2x2x1
jax: 0.10.0
libtpu: 0.0.40
codegen_flags: <defaults>
</compile_context>

<pallas_src>
import functools

import jax
import jax.numpy as jnp
from jax.experimental import pallas as pl
from jax.experimental.pallas import tpu as pltpu

# synthetic OPS table / primitive indices
_PRIMS = ("none", "skip_connect", "conv_1x1")
_P = len(_PRIMS)
_IDX_SKIP = 1
_IDX_CONV = 2
_BN_EPS = 1e-5
_LEAKY_SLOPE = 0.2


def _pick_lane_tile(dhw):
    for t in (2048, 1024, 512, 256, 128):
        if dhw % t == 0:
            return t
    raise ValueError(f"D*H*W={dhw} must be a multiple of 128")


# ---------------------------------------------------------------------------
# Kernel A: MixedOp edges + state sums + conv_end matmul + per-tile BN stats.
# ---------------------------------------------------------------------------
def _make_cell_kernel(blocks, C, empty_h1):
    def kernel(alpha_skip_ref, s1_ref, s0_ref, wg_ref, wend_ref,
               y_ref, ysum_ref, ysq_ref, cat_ref):
        # s1_ref / s0_ref : (C, TILE) f32           states 0 and 1
        # wg_ref          : (num_edges*C, C) f32    alpha_conv pre-folded
        # wend_ref        : (Cout, blocks*C) f32
        # y_ref           : (Cout, TILE) bf16       pre-BN conv_end output
        # ysum_ref/ysq_ref: (Cout, 1) f32           per-tile channel sums
        # cat_ref         : VMEM scratch (blocks*C, TILE) f32  (created states)

        def read_state(j):
            if j == 0:
                return s1_ref[...]
            if j == 1:
                return s0_ref[...]
            return cat_ref[(j - 2) * C:(j - 1) * C, :]

        offset = 0
        for i in range(blocks):
            s = None
            for j in range(i + 2):
                if empty_h1 and j == 0:
                    continue
                e = offset + j
                h = read_state(j)
                w_e = wg_ref[e * C:(e + 1) * C, :]              # static slice
                conv = jnp.maximum(
                    jnp.dot(w_e, h, preferred_element_type=jnp.float32), 0.0)
                contrib = alpha_skip_ref[e] * h + conv          # alpha_conv in w_e
                s = contrib if s is None else s + contrib
            offset += i + 2
            cat_ref[i * C:(i + 1) * C, :] = s                   # state (i+2)

        # conv_end: 1x1x1 Conv3d(blocks*C -> Cout), single K=blocks*C matmul.
        y = jnp.dot(wend_ref[...], cat_ref[...],
                    preferred_element_type=jnp.float32)         # (Cout, TILE)
        y_ref[...] = y.astype(y_ref.dtype)

        # Per-tile BatchNorm partial statistics (finalized globally outside).
        ysum_ref[...] = jnp.sum(y, axis=1, keepdims=True)
        ysq_ref[...] = jnp.sum(y * y, axis=1, keepdims=True)

    return kernel


# ---------------------------------------------------------------------------
# Kernel B: fused BatchNorm affine (pre-folded scale/bias) + LeakyReLU(0.2).
# ---------------------------------------------------------------------------
def _bn_act_kernel(y_ref, scale_ref, bias_ref, o_ref):
    z = y_ref[...].astype(jnp.float32) * scale_ref[...] + bias_ref[...]
    o_ref[...] = jnp.where(z >= 0.0, z, _LEAKY_SLOPE * z)


# ---------------------------------------------------------------------------
# Forward wrapper (only free reshapes and tiny (Cout,1) stat folding in XLA).
# ---------------------------------------------------------------------------
@functools.partial(jax.jit, static_argnames=("blocks", "empty_h1"))
def cell_spa_forward(s0, s1, weights, params, *, blocks, empty_h1=False):
    """
    s0, s1: (N, C, D, H, W) f32 (PyTorch NCDHW convention)
    weights: (num_edges, num_primitives) f32 (softmaxed DARTS alphas)
    params: dict with
      'edge_conv'  : list of (C, C) conv_1x1 weights, layout (C_out, C_in)
      'conv_end_w' : (32, blocks*C) 1x1x1 conv weight, layout (C_out, C_in)
      'bn_gamma', 'bn_beta' : (32, 1)
    returns (N, 32, D, H, W) f32
    """
    N, C, D, H, W = s0.shape
    DHW = D * H * W
    M = N * DHW
    Cout, cin_end = params["conv_end_w"].shape
    assert cin_end == blocks * C
    num_edges = sum(2 + i for i in range(blocks))
    assert weights.shape == (num_edges, _P)

    tile = _pick_lane_tile(DHW)
    T = DHW // tile

    # Free views only (merge trailing contiguous dims); no HBM transpose.
    x0 = s0.reshape(N, C, DHW)
    x1 = s1.reshape(N, C, DHW)

    # Fold softmaxed alpha_conv into the per-edge conv weights (alphas >= 0).
    wg = jnp.concatenate(
        [weights[e, _IDX_CONV] * params["edge_conv"][e] for e in range(num_edges)],
        axis=0).astype(jnp.float32)                                  # (E*C, C)
    alpha_skip = weights[:, _IDX_SKIP].astype(jnp.float32)           # SMEM scalars

    kernel_a = _make_cell_kernel(blocks, C, empty_h1)

    y, ysum, ysq = pl.pallas_call(
        kernel_a,
        out_shape=(
            jax.ShapeDtypeStruct((N, Cout, DHW), jnp.bfloat16),      # pre-BN y
            jax.ShapeDtypeStruct((N, T, Cout, 1), jnp.float32),      # per-tile sum
            jax.ShapeDtypeStruct((N, T, Cout, 1), jnp.float32),      # per-tile sumsq
        ),
        grid=(N, T),
        in_specs=[
            pl.BlockSpec(memory_space=pltpu.MemorySpace.SMEM),                # alpha_skip
            pl.BlockSpec((pl.Squeezed(), C, tile), lambda n, t: (n, 0, t)),   # s1
            pl.BlockSpec((pl.Squeezed(), C, tile), lambda n, t: (n, 0, t)),   # s0
            pl.BlockSpec((num_edges * C, C), lambda n, t: (0, 0)),            # wg (resident)
            pl.BlockSpec((Cout, blocks * C), lambda n, t: (0, 0)),            # conv_end w
        ],
        out_specs=(
            pl.BlockSpec((pl.Squeezed(), Cout, tile), lambda n, t: (n, 0, t)),
            pl.BlockSpec((pl.Squeezed(), pl.Squeezed(), Cout, 1),
                         lambda n, t: (n, t, 0, 0)),
            pl.BlockSpec((pl.Squeezed(), pl.Squeezed(), Cout, 1),
                         lambda n, t: (n, t, 0, 0)),
        ),
        scratch_shapes=[pltpu.VMEM((blocks * C, tile), jnp.float32)],
        compiler_params=pltpu.CompilerParams(
            dimension_semantics=("parallel", "parallel")),
    )(alpha_skip, x1, x0, wg, params["conv_end_w"].astype(jnp.float32))

    # Global (training-mode) BN statistics over all N*D*H*W, folded to scale/bias.
    total = jnp.sum(ysum, axis=(0, 1))                               # (Cout, 1)
    total_sq = jnp.sum(ysq, axis=(0, 1))                             # (Cout, 1)
    mean = total / M
    # TODO(synk): single-pass E[x^2]-E[x]^2 variance; use a second stats sweep
    #             if activation magnitudes ever make f32 cancellation an issue.
    var = jnp.maximum(total_sq / M - mean * mean, 0.0)
    scale = params["bn_gamma"] * jax.lax.rsqrt(var + _BN_EPS)        # (Cout, 1)
    bias = params["bn_beta"] - mean * scale                          # (Cout, 1)

    out = pl.pallas_call(
        _bn_act_kernel,
        out_shape=jax.ShapeDtypeStruct((N, Cout, DHW), jnp.float32),
        grid=(N, T),
        in_specs=[
            pl.BlockSpec((pl.Squeezed(), Cout, tile), lambda n, t: (n, 0, t)),
            pl.BlockSpec((Cout, 1), lambda n, t: (0, 0)),
            pl.BlockSpec((Cout, 1), lambda n, t: (0, 0)),
        ],
        out_specs=pl.BlockSpec((pl.Squeezed(), Cout, tile), lambda n, t: (n, 0, t)),
        compiler_params=pltpu.CompilerParams(
            dimension_semantics=("parallel", "parallel")),
    )(y, scale, bias)

    return out.reshape(N, Cout, D, H, W)


# ---------------------------------------------------------------------------
# Pure-JAX reference (same synthetic primitive set, unfolded alphas, f32).
# ---------------------------------------------------------------------------
def cell_spa_reference(s0, s1, weights, params, *, blocks, empty_h1=False):
    N, C, D, H, W = s0.shape
    x0 = s0.reshape(N, C, -1)
    x1 = s1.reshape(N, C, -1)
    states = [x1, x0]
    offset = 0
    for i in range(blocks):
        s = None
        for j, h in enumerate(list(states)):
            if empty_h1 and j == 0:
                continue
            e = offset + j
            conv = jnp.maximum(
                jnp.einsum("oc,ncm->nom", params["edge_conv"][e], h), 0.0)
            contrib = weights[e, _IDX_SKIP] * h + weights[e, _IDX_CONV] * conv
            s = contrib if s is None else s + contrib
        offset += len(states)
        states.append(s)
    cat = jnp.concatenate(states[-blocks:], axis=1)                  # (N, blocks*C, M)
    y = jnp.einsum("oc,ncm->nom", params["conv_end_w"], cat)         # (N, Cout, M)
    mean = jnp.mean(y, axis=(0, 2), keepdims=True)
    var = jnp.mean((y - mean) ** 2, axis=(0, 2), keepdims=True)
    y_hat = (y - mean) * jax.lax.rsqrt(var + _BN_EPS)
    y_hat = params["bn_gamma"][None, :, :] * y_hat + params["bn_beta"][None, :, :]
    y_hat = jnp.where(y_hat >= 0.0, y_hat, _LEAKY_SLOPE * y_hat)
    Cout = y_hat.shape[1]
    return y_hat.reshape(N, Cout, D, H, W)


# ---------------------------------------------------------------------------
if __name__ == "__main__":
    blocks = 3            # _steps = _multiplier = 3
    C = 8                 # blocks * C = 24 channels into conv_end (Conv3d(24, 32))
    Cout = 32
    N, D, H, W = 2, 4, 16, 16                      # D*H*W = 1024 (>=512-lane tiles)
    num_edges = sum(2 + i for i in range(blocks))  # 9

    key = jax.random.PRNGKey(0)
    keys = jax.random.split(key, num_edges + 5)

    # Deterministic synthetic parameters (shapes from __init__); conv weights
    # stored (C_out, C_in) like PyTorch 1x1x1 Conv3d kernels.
    edge_conv = [0.1 * jax.random.normal(keys[e], (C, C), jnp.float32)
                 for e in range(num_edges)]
    conv_end_w = 0.1 * jax.random.normal(keys[num_edges], (Cout, blocks * C),
                                         jnp.float32)
    bn_gamma = jnp.ones((Cout, 1), jnp.float32)
    bn_beta = jnp.zeros((Cout, 1), jnp.float32)
    params = dict(edge_conv=edge_conv, conv_end_w=conv_end_w,
                  bn_gamma=bn_gamma, bn_beta=bn_beta)

    # Architecture weights (softmaxed like DARTS alphas, so non-negative).
    alphas = jax.nn.softmax(
        jax.random.normal(keys[num_edges + 1], (num_edges, _P), jnp.float32),
        axis=-1)

    s0 = jax.random.normal(keys[num_edges + 2], (N, C, D, H, W), jnp.float32)
    s1 = jax.random.normal(keys[num_edges + 3], (N, C, D, H, W), jnp.float32)

    out = cell_spa_forward(s0, s1, alphas, params, blocks=blocks, empty_h1=False)
    out = jax.block_until_ready(out)
    assert out.shape == (N, Cout, D, H, W), out.shape

    ref = cell_spa_reference(s0, s1, alphas, params, blocks=blocks, empty_h1=False)
    ref = jax.block_until_ready(ref)
    max_err = float(jnp.max(jnp.abs(out - ref)))
    assert max_err < 5e-2, f"max abs error vs reference: {max_err}"

    print("KERNEL_OK")
</pallas_src>

<mosaic_0001>
module attributes {stable_mosaic.version = 11 : i64} {
  func.func @kernel(%arg0: i32, %arg1: i32, %arg2: memref<9xf32, #tpu.memory_space<smem>>, %arg3: memref<1x8x1024xf32, #tpu.memory_space<vmem>>, %arg4: memref<1x8x1024xf32, #tpu.memory_space<vmem>>, %arg5: memref<72x8xf32, #tpu.memory_space<vmem>>, %arg6: memref<32x24xf32, #tpu.memory_space<vmem>>, %arg7: memref<1x32x1024xbf16, #tpu.memory_space<vmem>>, %arg8: memref<1x1x32x1xf32, #tpu.memory_space<vmem>>, %arg9: memref<1x1x32x1xf32, #tpu.memory_space<vmem>>, %arg10: memref<24x1024xf32, #tpu.memory_space<vmem>>) attributes {dimension_semantics = [#tpu.dimension_semantics<parallel>, #tpu.dimension_semantics<parallel>], iteration_bounds = array<i64: 2, 1>, scalar_prefetch = 0 : i64, scratch_operands = 1 : i64, tpu.core_type = #tpu.core_type<tc>, window_params = [{transform_indices = @transform_0, window_bounds = array<i64: 9>}, {transform_indices = @transform_1, window_bounds = array<i64: 1, 8, 1024>}, {transform_indices = @transform_2, window_bounds = array<i64: 1, 8, 1024>}, {pipeline_mode = #tpu.pipeline_mode<synchronous>, transform_indices = @transform_3, window_bounds = array<i64: 72, 8>}, {pipeline_mode = #tpu.pipeline_mode<synchronous>, transform_indices = @transform_4, window_bounds = array<i64: 32, 24>}, {transform_indices = @transform_5, window_bounds = array<i64: 1, 32, 1024>}, {transform_indices = @transform_6, window_bounds = array<i64: 1, 1, 32, 1>}, {transform_indices = @transform_7, window_bounds = array<i64: 1, 1, 32, 1>}]} {
    %c0 = arith.constant 0 : index
    %c0_0 = arith.constant 0 : index
    %c0_1 = arith.constant 0 : index
    %0 = vector.load %arg3[%c0, %c0_0, %c0_1] : memref<1x8x1024xf32, #tpu.memory_space<vmem>>, vector<1x8x1024xf32>
    %1 = vector.shape_cast %0 : vector<1x8x1024xf32> to vector<8x1024xf32>
    %c0_2 = arith.constant 0 : index
    %c0_3 = arith.constant 0 : index
    %2 = vector.load %arg5[%c0_2, %c0_3] : memref<72x8xf32, #tpu.memory_space<vmem>>, vector<8x8xf32>
    %cst = arith.constant dense<0.000000e+00> : vector<8x1024xf32>
    %3 = tpu.matmul %2, %1, %cst {dimension_numbers = #tpu.dot_dimension_numbers<[1], [0], [0], [1], [0, 0, 1, 1], [], []>} : vector<8x8xf32>, vector<8x1024xf32>, vector<8x1024xf32> -> vector<8x1024xf32>
    %cst_4 = arith.constant 0.000000e+00 : f32
    %4 = vector.broadcast %cst_4 : f32 to vector<8x1024xf32>
    %5 = arith.maximumf %3, %4 : vector<8x1024xf32>
    %c0_5 = arith.constant 0 : index
    %6 = memref.load %arg2[%c0_5] : memref<9xf32, #tpu.memory_space<smem>>
    %7 = vector.broadcast %6 : f32 to vector<8x1024xf32>
    %8 = arith.mulf %7, %1 : vector<8x1024xf32>
    %9 = arith.addf %8, %5 : vector<8x1024xf32>
    %c0_6 = arith.constant 0 : index
    %c0_7 = arith.constant 0 : index
    %c0_8 = arith.constant 0 : index
    %10 = vector.load %arg4[%c0_6, %c0_7, %c0_8] : memref<1x8x1024xf32, #tpu.memory_space<vmem>>, vector<1x8x1024xf32>
    %11 = vector.shape_cast %10 : vector<1x8x1024xf32> to vector<8x1024xf32>
    %c8 = arith.constant 8 : index
    %c0_9 = arith.constant 0 : index
    %12 = vector.load %arg5[%c8, %c0_9] : memref<72x8xf32, #tpu.memory_space<vmem>>, vector<8x8xf32>
    %cst_10 = arith.constant dense<0.000000e+00> : vector<8x1024xf32>
    %13 = tpu.matmul %12, %11, %cst_10 {dimension_numbers = #tpu.dot_dimension_numbers<[1], [0], [0], [1], [0, 0, 1, 1], [], []>} : vector<8x8xf32>, vector<8x1024xf32>, vector<8x1024xf32> -> vector<8x1024xf32>
    %cst_11 = arith.constant 0.000000e+00 : f32
    %14 = vector.broadcast %cst_11 : f32 to vector<8x1024xf32>
    %15 = arith.maximumf %13, %14 : vector<8x1024xf32>
    %c1 = arith.constant 1 : index
    %16 = memref.load %arg2[%c1] : memref<9xf32, #tpu.memory_space<smem>>
    %17 = vector.broadcast %16 : f32 to vector<8x1024xf32>
    %18 = arith.mulf %17, %11 : vector<8x1024xf32>
    %19 = arith.addf %18, %15 : vector<8x1024xf32>
    %20 = arith.addf %9, %19 : vector<8x1024xf32>
    %c0_12 = arith.constant 0 : index
    %c0_13 = arith.constant 0 : index
    %21 = vector.load %arg10[%c0_12, %c0_13] : memref<24x1024xf32, #tpu.memory_space<vmem>>, vector<8x1024xf32>
    tpu.vector_store %arg10[%c0_12, %c0_13], %20 {strides = array<i32>} : memref<24x1024xf32, #tpu.memory_space<vmem>>, vector<8x1024xf32>,
    %c0_14 = arith.constant 0 : index
    %c0_15 = arith.constant 0 : index
    %c0_16 = arith.constant 0 : index
    %22 = vector.load %arg3[%c0_14, %c0_15, %c0_16] : memref<1x8x1024xf32, #tpu.memory_space<vmem>>, vector<1x8x1024xf32>
    %23 = vector.shape_cast %22 : vector<1x8x1024xf32> to vector<8x1024xf32>
    %c16 = arith.constant 16 : index
    %c0_17 = arith.constant 0 : index
    %24 = vector.load %arg5[%c16, %c0_17] : memref<72x8xf32, #tpu.memory_space<vmem>>, vector<8x8xf32>
    %cst_18 = arith.constant dense<0.000000e+00> : vector<8x1024xf32>
    %25 = tpu.matmul %24, %23, %cst_18 {dimension_numbers = #tpu.dot_dimension_numbers<[1], [0], [0], [1], [0, 0, 1, 1], [], []>} : vector<8x8xf32>, vector<8x1024xf32>, vector<8x1024xf32> -> vector<8x1024xf32>
    %cst_19 = arith.constant 0.000000e+00 : f32
    %26 = vector.broadcast %cst_19 : f32 to vector<8x1024xf32>
    %27 = arith.maximumf %25, %26 : vector<8x1024xf32>
    %c2 = arith.constant 2 : index
    %28 = memref.load %arg2[%c2] : memref<9xf32, #tpu.memory_space<smem>>
    %29 = vector.broadcast %28 : f32 to vector<8x1024xf32>
    %30 = arith.mulf %29, %23 : vector<8x1024xf32>
    %31 = arith.addf %30, %27 : vector<8x1024xf32>
    %c0_20 = arith.constant 0 : index
    %c0_21 = arith.constant 0 : index
    %c0_22 = arith.constant 0 : index
    %32 = vector.load %arg4[%c0_20, %c0_21, %c0_22] : memref<1x8x1024xf32, #tpu.memory_space<vmem>>, vector<1x8x1024xf32>
    %33 = vector.shape_cast %32 : vector<1x8x1024xf32> to vector<8x1024xf32>
    %c24 = arith.constant 24 : index
    %c0_23 = arith.constant 0 : index
    %34 = vector.load %arg5[%c24, %c0_23] : memref<72x8xf32, #tpu.memory_space<vmem>>, vector<8x8xf32>
    %cst_24 = arith.constant dense<0.000000e+00> : vector<8x1024xf32>
    %35 = tpu.matmul %34, %33, %cst_24 {dimension_numbers = #tpu.dot_dimension_numbers<[1], [0], [0], [1], [0, 0, 1, 1], [], []>} : vector<8x8xf32>, vector<8x1024xf32>, vector<8x1024xf32> -> vector<8x1024xf32>
    %cst_25 = arith.constant 0.000000e+00 : f32
    %36 = vector.broadcast %cst_25 : f32 to vector<8x1024xf32>
    %37 = arith.maximumf %35, %36 : vector<8x1024xf32>
    %c3 = arith.constant 3 : index
    %38 = memref.load %arg2[%c3] : memref<9xf32, #tpu.memory_space<smem>>
    %39 = vector.broadcast %38 : f32 to vector<8x1024xf32>
    %40 = arith.mulf %39, %33 : vector<8x1024xf32>
    %41 = arith.addf %40, %37 : vector<8x1024xf32>
    %42 = arith.addf %31, %41 : vector<8x1024xf32>
    %c0_26 = arith.constant 0 : index
    %c0_27 = arith.constant 0 : index
    %43 = vector.load %arg10[%c0_26, %c0_27] : memref<24x1024xf32, #tpu.memory_space<vmem>>, vector<8x1024xf32>
    %c32 = arith.constant 32 : index
    %c0_28 = arith.constant 0 : index
    %44 = vector.load %arg5[%c32, %c0_28] : memref<72x8xf32, #tpu.memory_space<vmem>>, vector<8x8xf32>
    %cst_29 = arith.constant dense<0.000000e+00> : vector<8x1024xf32>
    %45 = tpu.matmul %44, %43, %cst_29 {dimension_numbers = #tpu.dot_dimension_numbers<[1], [0], [0], [1], [0, 0, 1, 1], [], []>} : vector<8x8xf32>, vector<8x1024xf32>, vector<8x1024xf32> -> vector<8x1024xf32>
    %cst_30 = arith.constant 0.000000e+00 : f32
    %46 = vector.broadcast %cst_30 : f32 to vector<8x1024xf32>
    %47 = arith.maximumf %45, %46 : vector<8x1024xf32>
    %c4 = arith.constant 4 : index
    %48 = memref.load %arg2[%c4] : memref<9xf32, #tpu.memory_space<smem>>
    %49 = vector.broadcast %48 : f32 to vector<8x1024xf32>
    %50 = arith.mulf %49, %43 : vector<8x1024xf32>
    %51 = arith.addf %50, %47 : vector<8x1024xf32>
    %52 = arith.addf %42, %51 : vector<8x1024xf32>
    %c8_31 = arith.constant 8 : index
    %c0_32 = arith.constant 0 : index
    %53 = vector.load %arg10[%c8_31, %c0_32] : memref<24x1024xf32, #tpu.memory_space<vmem>>, vector<8x1024xf32>
    tpu.vector_store %arg10[%c8_31, %c0_32], %52 {strides = array<i32>} : memref<24x1024xf32, #tpu.memory_space<vmem>>, vector<8x1024xf32>,
    %c0_33 = arith.constant 0 : index
    %c0_34 = arith.constant 0 : index
    %c0_35 = arith.constant 0 : index
    %54 = vector.load %arg3[%c0_33, %c0_34, %c0_35] : memref<1x8x1024xf32, #tpu.memory_space<vmem>>, vector<1x8x1024xf32>
    %55 = vector.shape_cast %54 : vector<1x8x1024xf32> to vector<8x1024xf32>
    %c40 = arith.constant 40 : index
    %c0_36 = arith.constant 0 : index
    %56 = vector.load %arg5[%c40, %c0_36] : memref<72x8xf32, #tpu.memory_space<vmem>>, vector<8x8xf32>
    %cst_37 = arith.constant dense<0.000000e+00> : vector<8x1024xf32>
    %57 = tpu.matmul %56, %55, %cst_37 {dimension_numbers = #tpu.dot_dimension_numbers<[1], [0], [0], [1], [0, 0, 1, 1], [], []>} : vector<8x8xf32>, vector<8x1024xf32>, vector<8x1024xf32> -> vector<8x1024xf32>
    %cst_38 = arith.constant 0.000000e+00 : f32
    %58 = vector.broadcast %cst_38 : f32 to vector<8x1024xf32>
    %59 = arith.maximumf %57, %58 : vector<8x1024xf32>
    %c5 = arith.constant 5 : index
    %60 = memref.load %arg2[%c5] : memref<9xf32, #tpu.memory_space<smem>>
    %61 = vector.broadcast %60 : f32 to vector<8x1024xf32>
    %62 = arith.mulf %61, %55 : vector<8x1024xf32>
    %63 = arith.addf %62, %59 : vector<8x1024xf32>
    %c0_39 = arith.constant 0 : index
    %c0_40 = arith.constant 0 : index
    %c0_41 = arith.constant 0 : index
    %64 = vector.load %arg4[%c0_39, %c0_40, %c0_41] : memref<1x8x1024xf32, #tpu.memory_space<vmem>>, vector<1x8x1024xf32>
    %65 = vector.shape_cast %64 : vector<1x8x1024xf32> to vector<8x1024xf32>
    %c48 = arith.constant 48 : index
    %c0_42 = arith.constant 0 : index
    %66 = vector.load %arg5[%c48, %c0_42] : memref<72x8xf32, #tpu.memory_space<vmem>>, vector<8x8xf32>
    %cst_43 = arith.constant dense<0.000000e+00> : vector<8x1024xf32>
    %67 = tpu.matmul %66, %65, %cst_43 {dimension_numbers = #tpu.dot_dimension_numbers<[1], [0], [0], [1], [0, 0, 1, 1], [], []>} : vector<8x8xf32>, vector<8x1024xf32>, vector<8x1024xf32> -> vector<8x1024xf32>
    %cst_44 = arith.constant 0.000000e+00 : f32
    %68 = vector.broadcast %cst_44 : f32 to vector<8x1024xf32>
    %69 = arith.maximumf %67, %68 : vector<8x1024xf32>
    %c6 = arith.constant 6 : index
    %70 = memref.load %arg2[%c6] : memref<9xf32, #tpu.memory_space<smem>>
    %71 = vector.broadcast %70 : f32 to vector<8x1024xf32>
    %72 = arith.mulf %71, %65 : vector<8x1024xf32>
    %73 = arith.addf %72, %69 : vector<8x1024xf32>
    %74 = arith.addf %63, %73 : vector<8x1024xf32>
    %c0_45 = arith.constant 0 : index
    %c0_46 = arith.constant 0 : index
    %75 = vector.load %arg10[%c0_45, %c0_46] : memref<24x1024xf32, #tpu.memory_space<vmem>>, vector<8x1024xf32>
    %c56 = arith.constant 56 : index
    %c0_47 = arith.constant 0 : index
    %76 = vector.load %arg5[%c56, %c0_47] : memref<72x8xf32, #tpu.memory_space<vmem>>, vector<8x8xf32>
    %cst_48 = arith.constant dense<0.000000e+00> : vector<8x1024xf32>
    %77 = tpu.matmul %76, %75, %cst_48 {dimension_numbers = #tpu.dot_dimension_numbers<[1], [0], [0], [1], [0, 0, 1, 1], [], []>} : vector<8x8xf32>, vector<8x1024xf32>, vector<8x1024xf32> -> vector<8x1024xf32>
    %cst_49 = arith.constant 0.000000e+00 : f32
    %78 = vector.broadcast %cst_49 : f32 to vector<8x1024xf32>
    %79 = arith.maximumf %77, %78 : vector<8x1024xf32>
    %c7 = arith.constant 7 : index
    %80 = memref.load %arg2[%c7] : memref<9xf32, #tpu.memory_space<smem>>
    %81 = vector.broadcast %80 : f32 to vector<8x1024xf32>
    %82 = arith.mulf %81, %75 : vector<8x1024xf32>
    %83 = arith.addf %82, %79 : vector<8x1024xf32>
    %84 = arith.addf %74, %83 : vector<8x1024xf32>
    %c8_50 = arith.constant 8 : index
    %c0_51 = arith.constant 0 : index
    %85 = vector.load %arg10[%c8_50, %c0_51] : memref<24x1024xf32, #tpu.memory_space<vmem>>, vector<8x1024xf32>
    %c64 = arith.constant 64 : index
    %c0_52 = arith.constant 0 : index
    %86 = vector.load %arg5[%c64, %c0_52] : memref<72x8xf32, #tpu.memory_space<vmem>>, vector<8x8xf32>
    %cst_53 = arith.constant dense<0.000000e+00> : vector<8x1024xf32>
    %87 = tpu.matmul %86, %85, %cst_53 {dimension_numbers = #tpu.dot_dimension_numbers<[1], [0], [0], [1], [0, 0, 1, 1], [], []>} : vector<8x8xf32>, vector<8x1024xf32>, vector<8x1024xf32> -> vector<8x1024xf32>
    %cst_54 = arith.constant 0.000000e+00 : f32
    %88 = vector.broadcast %cst_54 : f32 to vector<8x1024xf32>
    %89 = arith.maximumf %87, %88 : vector<8x1024xf32>
    %c8_55 = arith.constant 8 : index
    %90 = memref.load %arg2[%c8_55] : memref<9xf32, #tpu.memory_space<smem>>
    %91 = vector.broadcast %90 : f32 to vector<8x1024xf32>
    %92 = arith.mulf %91, %85 : vector<8x1024xf32>
    %93 = arith.addf %92, %89 : vector<8x1024xf32>
    %94 = arith.addf %84, %93 : vector<8x1024xf32>
    %c16_56 = arith.constant 16 : index
    %c0_57 = arith.constant 0 : index
    %95 = vector.load %arg10[%c16_56, %c0_57] : memref<24x1024xf32, #tpu.memory_space<vmem>>, vector<8x1024xf32>
    tpu.vector_store %arg10[%c16_56, %c0_57], %94 {strides = array<i32>} : memref<24x1024xf32, #tpu.memory_space<vmem>>, vector<8x1024xf32>,
    %c0_58 = arith.constant 0 : index
    %c0_59 = arith.constant 0 : index
    %96 = vector.load %arg6[%c0_58, %c0_59] : memref<32x24xf32, #tpu.memory_space<vmem>>, vector<32x24xf32>
    %c0_60 = arith.constant 0 : index
    %c0_61 = arith.constant 0 : index
    %97 = vector.load %arg10[%c0_60, %c0_61] : memref<24x1024xf32, #tpu.memory_space<vmem>>, vector<24x1024xf32>
    %cst_62 = arith.constant dense<0.000000e+00> : vector<32x1024xf32>
    %98 = tpu.matmul %96, %97, %cst_62 {dimension_numbers = #tpu.dot_dimension_numbers<[1], [0], [0], [1], [0, 0, 1, 1], [], []>} : vector<32x24xf32>, vector<24x1024xf32>, vector<32x1024xf32> -> vector<32x1024xf32>
    %99 = arith.truncf %98 : vector<32x1024xf32> to vector<32x1024xbf16>
    %c0_63 = arith.constant 0 : index
    %c0_64 = arith.constant 0 : index
    %c0_65 = arith.constant 0 : index
    %100 = vector.load %arg7[%c0_63, %c0_64, %c0_65] : memref<1x32x1024xbf16, #tpu.memory_space<vmem>>, vector<1x32x1024xbf16>
    %101 = vector.shape_cast %100 : vector<1x32x1024xbf16> to vector<32x1024xbf16>
    %102 = vector.shape_cast %99 : vector<32x1024xbf16> to vector<1x32x1024xbf16>
    tpu.vector_store %arg7[%c0_63, %c0_64, %c0_65], %102 {strides = array<i32>} : memref<1x32x1024xbf16, #tpu.memory_space<vmem>>, vector<1x32x1024xbf16>,
    %cst_66 = arith.constant dense<0.000000e+00> : vector<32xf32>
    %103 = vector.multi_reduction <add>, %98, %cst_66 [1] : vector<32x1024xf32> to vector<32xf32>
    %104 = vector.shape_cast %103 : vector<32xf32> to vector<32x1xf32>
    %c0_67 = arith.constant 0 : index
    %c0_68 = arith.constant 0 : index
    %c0_69 = arith.constant 0 : index
    %c0_70 = arith.constant 0 : index
    %105 = vector.load %arg8[%c0_67, %c0_68, %c0_69, %c0_70] : memref<1x1x32x1xf32, #tpu.memory_space<vmem>>, vector<1x1x32x1xf32>
    %106 = vector.shape_cast %105 : vector<1x1x32x1xf32> to vector<32x1xf32>
    %107 = vector.shape_cast %104 : vector<32x1xf32> to vector<1x1x32x1xf32>
    tpu.vector_store %arg8[%c0_67, %c0_68, %c0_69, %c0_70], %107 {strides = array<i32>} : memref<1x1x32x1xf32, #tpu.memory_space<vmem>>, vector<1x1x32x1xf32>,
    %108 = arith.mulf %98, %98 : vector<32x1024xf32>
    %cst_71 = arith.constant dense<0.000000e+00> : vector<32xf32>
    %109 = vector.multi_reduction <add>, %108, %cst_71 [1] : vector<32x1024xf32> to vector<32xf32>
    %110 = vector.shape_cast %109 : vector<32xf32> to vector<32x1xf32>
    %c0_72 = arith.constant 0 : index
    %c0_73 = arith.constant 0 : index
    %c0_74 = arith.constant 0 : index
    %c0_75 = arith.constant 0 : index
    %111 = vector.load %arg9[%c0_72, %c0_73, %c0_74, %c0_75] : memref<1x1x32x1xf32, #tpu.memory_space<vmem>>, vector<1x1x32x1xf32>
    %112 = vector.shape_cast %111 : vector<1x1x32x1xf32> to vector<32x1xf32>
    %113 = vector.shape_cast %110 : vector<32x1xf32> to vector<1x1x32x1xf32>
    tpu.vector_store %arg9[%c0_72, %c0_73, %c0_74, %c0_75], %113 {strides = array<i32>} : memref<1x1x32x1xf32, #tpu.memory_space<vmem>>, vector<1x1x32x1xf32>,
    return
  }
  func.func @transform_0(%arg0: i32, %arg1: i32) -> i32 {
    %c0_i32 = arith.constant 0 : i32
    %c0_i32_0 = arith.constant 0 : i32
    return %c0_i32 : i32
  }
  func.func @transform_1(%arg0: i32, %arg1: i32) -> (i32, i32, i32) {
    %c0_i32 = arith.constant 0 : i32
    %c0_i32_0 = arith.constant 0 : i32
    return %arg0, %c0_i32, %arg1 : i32, i32, i32
  }
  func.func @transform_2(%arg0: i32, %arg1: i32) -> (i32, i32, i32) {
    %c0_i32 = arith.constant 0 : i32
    %c0_i32_0 = arith.constant 0 : i32
    return %arg0, %c0_i32, %arg1 : i32, i32, i32
  }
  func.func @transform_3(%arg0: i32, %arg1: i32) -> (i32, i32) {
    %c0_i32 = arith.constant 0 : i32
    %c0_i32_0 = arith.constant 0 : i32
    %c0_i32_1 = arith.constant 0 : i32
    return %c0_i32, %c0_i32_0 : i32, i32
  }
  func.func @transform_4(%arg0: i32, %arg1: i32) -> (i32, i32) {
    %c0_i32 = arith.constant 0 : i32
    %c0_i32_0 = arith.constant 0 : i32
    %c0_i32_1 = arith.constant 0 : i32
    return %c0_i32, %c0_i32_0 : i32, i32
  }
  func.func @transform_5(%arg0: i32, %arg1: i32) -> (i32, i32, i32) {
    %c0_i32 = arith.constant 0 : i32
    %c0_i32_0 = arith.constant 0 : i32
    return %arg0, %c0_i32, %arg1 : i32, i32, i32
  }
  func.func @transform_6(%arg0: i32, %arg1: i32) -> (i32, i32, i32, i32) {
    %c0_i32 = arith.constant 0 : i32
    %c0_i32_0 = arith.constant 0 : i32
    %c0_i32_1 = arith.constant 0 : i32
    return %arg0, %arg1, %c0_i32, %c0_i32_0 : i32, i32, i32, i32
  }
  func.func @transform_7(%arg0: i32, %arg1: i32) -> (i32, i32, i32, i32) {
    %c0_i32 = arith.constant 0 : i32
    %c0_i32_0 = arith.constant 0 : i32
    %c0_i32_1 = arith.constant 0 : i32
    return %arg0, %arg1, %c0_i32, %c0_i32_0 : i32, i32, i32, i32
  }
}

module attributes {stable_mosaic.version = 11 : i64} {
  func.func @_bn_act_kernel(%arg0: i32, %arg1: i32, %arg2: memref<1x32x1024xbf16, #tpu.memory_space<vmem>>, %arg3: memref<32x1xf32, #tpu.memory_space<vmem>>, %arg4: memref<32x1xf32, #tpu.memory_space<vmem>>, %arg5: memref<1x32x1024xf32, #tpu.memory_space<vmem>>) attributes {dimension_semantics = [#tpu.dimension_semantics<parallel>, #tpu.dimension_semantics<parallel>], iteration_bounds = array<i64: 2, 1>, scalar_prefetch = 0 : i64, scratch_operands = 0 : i64, tpu.core_type = #tpu.core_type<tc>, window_params = [{transform_indices = @transform_0, window_bounds = array<i64: 1, 32, 1024>}, {pipeline_mode = #tpu.pipeline_mode<synchronous>, transform_indices = @transform_1, window_bounds = array<i64: 32, 1>}, {pipeline_mode = #tpu.pipeline_mode<synchronous>, transform_indices = @transform_2, window_bounds = array<i64: 32, 1>}, {transform_indices = @transform_3, window_bounds = array<i64: 1, 32, 1024>}]} {
    %c0 = arith.constant 0 : index
    %c0_0 = arith.constant 0 : index
    %c0_1 = arith.constant 0 : index
    %0 = vector.load %arg2[%c0, %c0_0, %c0_1] : memref<1x32x1024xbf16, #tpu.memory_space<vmem>>, vector<1x32x1024xbf16>
    %1 = vector.shape_cast %0 : vector<1x32x1024xbf16> to vector<32x1024xbf16>
    %2 = arith.extf %1 : vector<32x1024xbf16> to vector<32x1024xf32>
    %c0_2 = arith.constant 0 : index
    %c0_3 = arith.constant 0 : index
    %3 = vector.load %arg3[%c0_2, %c0_3] : memref<32x1xf32, #tpu.memory_space<vmem>>, vector<32x1xf32>
    %4 = vector.broadcast %3 : vector<32x1xf32> to vector<32x1024xf32>
    %5 = arith.mulf %2, %4 : vector<32x1024xf32>
    %c0_4 = arith.constant 0 : index
    %c0_5 = arith.constant 0 : index
    %6 = vector.load %arg4[%c0_4, %c0_5] : memref<32x1xf32, #tpu.memory_space<vmem>>, vector<32x1xf32>
    %7 = vector.broadcast %6 : vector<32x1xf32> to vector<32x1024xf32>
    %8 = arith.addf %5, %7 : vector<32x1024xf32>
    %cst = arith.constant 0.000000e+00 : f32
    %9 = vector.broadcast %cst : f32 to vector<32x1024xf32>
    %10 = arith.cmpf oge, %8, %9 : vector<32x1024xf32>
    %cst_6 = arith.constant 2.000000e-01 : f32
    %11 = vector.broadcast %cst_6 : f32 to vector<32x1024xf32>
    %12 = arith.mulf %11, %8 : vector<32x1024xf32>
    %13 = arith.select %10, %8, %12 : vector<32x1024xi1>, vector<32x1024xf32>
    %c0_7 = arith.constant 0 : index
    %c0_8 = arith.constant 0 : index
    %c0_9 = arith.constant 0 : index
    %14 = vector.load %arg5[%c0_7, %c0_8, %c0_9] : memref<1x32x1024xf32, #tpu.memory_space<vmem>>, vector<1x32x1024xf32>
    %15 = vector.shape_cast %14 : vector<1x32x1024xf32> to vector<32x1024xf32>
    %16 = vector.shape_cast %13 : vector<32x1024xf32> to vector<1x32x1024xf32>
    tpu.vector_store %arg5[%c0_7, %c0_8, %c0_9], %16 {strides = array<i32>} : memref<1x32x1024xf32, #tpu.memory_space<vmem>>, vector<1x32x1024xf32>,
    return
  }
  func.func @transform_0(%arg0: i32, %arg1: i32) -> (i32, i32, i32) {
    %c0_i32 = arith.constant 0 : i32
    %c0_i32_0 = arith.constant 0 : i32
    return %arg0, %c0_i32, %arg1 : i32, i32, i32
  }
  func.func @transform_1(%arg0: i32, %arg1: i32) -> (i32, i32) {
    %c0_i32 = arith.constant 0 : i32
    %c0_i32_0 = arith.constant 0 : i32
    %c0_i32_1 = arith.constant 0 : i32
    return %c0_i32, %c0_i32_0 : i32, i32
  }
  func.func @transform_2(%arg0: i32, %arg1: i32) -> (i32, i32) {
    %c0_i32 = arith.constant 0 : i32
    %c0_i32_0 = arith.constant 0 : i32
    %c0_i32_1 = arith.constant 0 : i32
    return %c0_i32, %c0_i32_0 : i32, i32
  }
  func.func @transform_3(%arg0: i32, %arg1: i32) -> (i32, i32, i32) {
    %c0_i32 = arith.constant 0 : i32
    %c0_i32_0 = arith.constant 0 : i32
    return %arg0, %c0_i32, %arg1 : i32, i32, i32
  }
}

</mosaic_0001>

<bundles_post_ra>
// kernel: cell_spa_forward.3
= control target key start
LH: loop header
LB: loop body
LE: loop exit
PB: predicated region body
PF: predicated region fallthrough
CT: control target
= control target key end

     0   :  { %s670_s12 = smov 0   ;;  %s672_s13 = smov 0   ;;  %s905_s0 = inlined_call_operand.vmem [shape: bf16[2,32,1024], index: 0, kind: input, shape index: {}]   ;;  %s906_s1 = inlined_call_operand.vmem [shape: f32[32,1], index: 1, kind: input, shape index: {}]   ;;  %s907_s2 = inlined_call_operand.vmem [shape: f32[32,1], index: 2, kind: input, shape index: {}]   ;;  %s908_s3 = inlined_call_operand.vmem [shape: f32[2,32,1024], index: 3, kind: output, shape index: {}]  }
   0x1   :  { %s674_s14 = smov 0  }
   0x2 LB: > { %s25_s15 = sadd.s32 1, %s643_s13  ;;  %p589_p0 = scmp.ge.s32.totalorder %s647_s14, 1  ;;  %s647_s14 = sphi %s674_s14, %s13_s14   ;;  %s643_s13 = sphi %s672_s13, %s910_s13   ;;  %s639_s12 = sphi %s670_s12, %s909_s12  }
   0x3   : > { %p27_p1 = scmp.ge.s32.totalorder %s25_s15, 2  ;;  %p158_p2 = scmp.lt.s32.totalorder %s647_s14, 3 }
   0x5   : > { %s912_s15 = smov (%p27_p1, %s25_s15), 0  ;;  %p159_p3 = pnand %p589_p0, %p158_p2 }
   0x6   : > { %v260_v0 = vld [vmem:[%s906_s1 + $0x10] sm:$0xff] (!%p159_p3)  ;;  %v258_v1 = vld [vmem:[%s906_s1] sm:$0xff] (!%p159_p3)  ;;  %v649_v2 = vmov (!%p159_p3), 0   ;;  %v261_v3 = vld [vmem:[%s906_s1 + $0x18] sm:$0xff] (!%p159_p3)  ;;  %p191_p4 = scmp.lt.s32.totalorder (!%p159_p3), %s639_s12, 1 }
   0x7   : > { %162 = sbr.rel (%p159_p3) target bundleno = 179 (0xb3), region = 32  ;;  %624 = vset.pattern.permute.xlu1 (!%p159_p3), %v649_v2  ;;  %623 = vset.pattern.permute.xlu0 (!%p159_p3), %v649_v2  ;;  %v259_v4 = vld [vmem:[%s906_s1 + $0x8] sm:$0xff] (!%p159_p3)  ;;  %v314_v6 = vld [vmem:[%s907_s2] sm:$0xff] (!%p159_p3)  ;;  %v317_v7 = vld [vmem:[%s907_s2 + $0x18] sm:$0xff] (!%p159_p3) }
   0x8   : > { %274 = vperm.xlu1 (!%p159_p3), %624, %v260_v0   ;;  %264 = vperm.xlu0 (!%p159_p3), %623, %v258_v1   ;;  %v315_v5 = vld [vmem:[%s907_s2 + $0x8] sm:$0xff] (!%p159_p3)  ;;  %v316_v8 = vld [vmem:[%s907_s2 + $0x10] sm:$0xff] (!%p159_p3) }
   0xc   : > { %279 = vperm.xlu1 (!%p159_p3), %624, %v261_v3   ;;  %269 = vperm.xlu0 (!%p159_p3), %623, %v259_v4  }
   0xe   : > { %s914_s12 = smov (!%p191_p4, %s639_s12), 1 }
   0xf   : > { %s596_s5 = sshll.u32 %s914_s12, 7  ;;  %s597_s9 = sshll.u32 %s914_s12, 8 }
  0x10   : > { %325 = vperm.xlu1 %624, %v315_v5   ;;  %320 = vperm.xlu0 %623, %v314_v6   ;;  %s722_s8 = scalar_lea.vmem %s905_s0, %s596_s5  ;;  %s808_s16 = scalar_lea.vmem %s908_s3, %s597_s9 }
  0x11   : > { %v210_v9 = vld [vmem:[%s722_s8] sm:$0xff]  ;;  %v211_v10 = vld [vmem:[%s722_s8 + $0x8] sm:$0xff]  ;;  %v212_v11 = vld [vmem:[%s722_s8 + $0x10] sm:$0xff] }
  0x12   : > { %v213_v12 = vld [vmem:[%s722_s8 + $0x18] sm:$0xff]  ;;  %v729_v13 = vld [vmem:[%s722_s8 + $0x20] sm:$0xff]  ;;  %v732_v14 = vld [vmem:[%s722_s8 + $0x28] sm:$0xff]  ;;  %v226_v15 = vunpack.c.l.bf16 %v210_v9  ;;  %v227_v16 = vunpack.c.h.bf16 %v210_v9  ;;  %v228_v17 = vunpack.c.l.bf16 %v211_v10  ;;  %v229_v18 = vunpack.c.h.bf16 %v211_v10 }
  0x13   : > { %v735_v19 = vld [vmem:[%s722_s8 + $0x30] sm:$0xff]  ;;  %v738_v20 = vld [vmem:[%s722_s8 + $0x38] sm:$0xff]  ;;  %v230_v21 = vunpack.c.l.bf16 %v212_v11  ;;  %v231_v22 = vunpack.c.h.bf16 %v212_v11  ;;  %v232_v23 = vunpack.c.l.bf16 %v213_v12  ;;  %v233_v24 = vunpack.c.h.bf16 %v213_v12  ;;  %v222_v25 = vld [vmem:[%s722_s8 + $0x60] sm:$0xff] }
  0x14   : > { %335 = vperm.xlu1 %624, %v317_v7   ;;  %330 = vperm.xlu0 %623, %v316_v8   ;;  %v742_v26 = vld [vmem:[%s722_s8 + $0x68] sm:$0xff]  ;;  %v234_v27 = vunpack.c.l.bf16 %v729_v13  ;;  %v235_v28 = vunpack.c.h.bf16 %v729_v13  ;;  %v236_v29 = vunpack.c.l.bf16 %v732_v14  ;;  %v237_v30 = vunpack.c.h.bf16 %v732_v14  ;;  %v224_v31 = vld [vmem:[%s722_s8 + $0x70] sm:$0xff]  ;;  %v225_v32 = vld [vmem:[%s722_s8 + $0x78] sm:$0xff] }
  0x15   : > { %v238_v33 = vunpack.c.l.bf16 %v735_v19  ;;  %v239_v34 = vunpack.c.h.bf16 %v735_v19  ;;  %v240_v35 = vunpack.c.l.bf16 %v738_v20  ;;  %v241_v36 = vunpack.c.h.bf16 %v738_v20  ;;  %v218_v37 = vld [vmem:[%s722_s8 + $0x40] sm:$0xff]  ;;  %v219_v38 = vld [vmem:[%s722_s8 + $0x48] sm:$0xff]  ;;  %v220_v43 = vld [vmem:[%s722_s8 + $0x50] sm:$0xff] }
  0x16   : > { %v250_v39 = vunpack.c.l.bf16 %v222_v25  ;;  %v251_v40 = vunpack.c.h.bf16 %v222_v25  ;;  %v252_v41 = vunpack.c.l.bf16 %v742_v26  ;;  %v253_v42 = vunpack.c.h.bf16 %v742_v26  ;;  %v221_v44 = vld [vmem:[%s722_s8 + $0x58] sm:$0xff] }
  0x17   : > { %v254_v45 = vunpack.c.l.bf16 %v224_v31  ;;  %v255_v46 = vunpack.c.h.bf16 %v224_v31  ;;  %v256_v47 = vunpack.c.l.bf16 %v225_v32  ;;  %v257_v48 = vunpack.c.h.bf16 %v225_v32 }
  0x18   : > { %v242_v49 = vunpack.c.l.bf16 %v218_v37  ;;  %v243_v50 = vunpack.c.h.bf16 %v218_v37  ;;  %v244_v51 = vunpack.c.l.bf16 %v219_v38  ;;  %v245_v52 = vunpack.c.h.bf16 %v219_v38 }
  0x19   : > { %v246_v55 = vunpack.c.l.bf16 %v220_v43  ;;  %v247_v56 = vunpack.c.h.bf16 %v220_v43  ;;  %v248_v57 = vunpack.c.l.bf16 %v221_v44  ;;  %v249_v58 = vunpack.c.h.bf16 %v221_v44 }
  0x87   : > { %v275_v53 = vpop.permute.xlu1 %274  ;;  %v265_v54 = vpop.permute.xlu0 %264 }
  0x88   : > { %v282_v59 = vmul.f32 %v265_v54, %v226_v15  ;;  %v283_v60 = vmul.f32 %v265_v54, %v227_v16  ;;  %v760_v61 = vmul.f32 %v265_v54, %v228_v17  ;;  %v762_v62 = vmul.f32 %v265_v54, %v229_v18 }
  0x89   : > { %v764_v63 = vmul.f32 %v265_v54, %v230_v21  ;;  %v766_v0 = vmul.f32 %v265_v54, %v231_v22  ;;  %v768_v1 = vmul.f32 %v265_v54, %v232_v23  ;;  %v770_v2 = vmul.f32 %v265_v54, %v233_v24 }
  0x8a   : > { %v772_v3 = vmul.f32 %v275_v53, %v242_v49  ;;  %v774_v4 = vmul.f32 %v275_v53, %v243_v50  ;;  %v776_v5 = vmul.f32 %v275_v53, %v244_v51  ;;  %v778_v6 = vmul.f32 %v275_v53, %v245_v52 }
  0x8b   : > { %v280_v7 = vpop.permute.xlu1 %279  ;;  %v270_v8 = vpop.permute.xlu0 %269  ;;  %v780_v9 = vmul.f32 %v275_v53, %v246_v55  ;;  %v782_v10 = vmul.f32 %v275_v53, %v247_v56  ;;  %v784_v11 = vmul.f32 %v275_v53, %v248_v57  ;;  %v786_v12 = vmul.f32 %v275_v53, %v249_v58 }
  0x8c   : > { %v290_v13 = vmul.f32 %v270_v8, %v234_v27  ;;  %v291_v14 = vmul.f32 %v270_v8, %v235_v28  ;;  %v292_v15 = vmul.f32 %v270_v8, %v236_v29  ;;  %v293_v16 = vmul.f32 %v270_v8, %v237_v30 }
  0x8d   : > { %v294_v17 = vmul.f32 %v270_v8, %v238_v33  ;;  %v295_v18 = vmul.f32 %v270_v8, %v239_v34  ;;  %v296_v19 = vmul.f32 %v270_v8, %v240_v35  ;;  %v297_v20 = vmul.f32 %v270_v8, %v241_v36 }
  0x8e   : > { %v788_v21 = vmul.f32 %v280_v7, %v250_v39  ;;  %v790_v22 = vmul.f32 %v280_v7, %v251_v40  ;;  %v792_v23 = vmul.f32 %v280_v7, %v252_v41  ;;  %v794_v24 = vmul.f32 %v280_v7, %v253_v42 }
  0x8f   : > { %v326_v25 = vpop.permute.xlu1 %325  ;;  %v796_v26 = vmul.f32 %v280_v7, %v254_v45  ;;  %v798_v27 = vmul.f32 %v280_v7, %v255_v46  ;;  %v800_v28 = vmul.f32 %v280_v7, %v256_v47  ;;  %v802_v29 = vmul.f32 %v280_v7, %v257_v48  ;;  %v321_v38 = vpop.permute.xlu0 %320 }
  0x90   : > { %v346_v30 = vadd.f32 %v326_v25, %v290_v13  ;;  %v347_v31 = vadd.f32 %v326_v25, %v291_v14  ;;  %v348_v32 = vadd.f32 %v326_v25, %v292_v15  ;;  %v349_v33 = vadd.f32 %v326_v25, %v293_v16 }
  0x91   : > { %v350_v34 = vadd.f32 %v326_v25, %v294_v17  ;;  %v351_v35 = vadd.f32 %v326_v25, %v295_v18  ;;  %v352_v36 = vadd.f32 %v326_v25, %v296_v19  ;;  %v353_v37 = vadd.f32 %v326_v25, %v297_v20 }
  0x92   : > { %vm378_vm0 = vcmp.ge.f32.partialorder %v346_v30, 0.0  ;;  %vm379_vm1 = vcmp.ge.f32.partialorder %v347_v31, 0.0  ;;  %vm380_vm2 = vcmp.ge.f32.partialorder %v348_v32, 0.0  ;;  %vm381_vm3 = vcmp.ge.f32.partialorder %v349_v33, 0.0 }
  0x93   : > { %vm382_vm4 = vcmp.ge.f32.partialorder %v350_v34, 0.0  ;;  %vm383_vm5 = vcmp.ge.f32.partialorder %v351_v35, 0.0  ;;  %vm384_vm6 = vcmp.ge.f32.partialorder %v352_v36, 0.0  ;;  %vm385_vm7 = vcmp.ge.f32.partialorder %v353_v37, 0.0  ;;  %v336_v13 = vpop.permute.xlu1 %335 }
  0x94   : > { %v410_v39 = vmul.f32 0.2, %v346_v30  ;;  %v411_v40 = vmul.f32 0.2, %v347_v31  ;;  %v412_v41 = vmul.f32 0.2, %v348_v32  ;;  %v338_v42 = vadd.f32 %v321_v38, %v282_v59 }
  0x95   : > { %v413_v43 = vmul.f32 0.2, %v349_v33  ;;  %v414_v44 = vmul.f32 0.2, %v350_v34  ;;  %v415_v45 = vmul.f32 0.2, %v351_v35  ;;  %v339_v46 = vadd.f32 %v321_v38, %v283_v60 }
  0x96   : > { %v416_v47 = vmul.f32 0.2, %v352_v36  ;;  %v417_v48 = vmul.f32 0.2, %v353_v37  ;;  %v442_v49 = vsel %vm378_vm0, %v346_v30, %v410_v39  ;;  %v443_v50 = vsel %vm379_vm1, %v347_v31, %v411_v40 }
  0x97   : > { %v444_v51 = vsel %vm380_vm2, %v348_v32, %v412_v41  ;;  %v445_v52 = vsel %vm381_vm3, %v349_v33, %v413_v43  ;;  %v446_v53 = vsel %vm382_vm4, %v350_v34, %v414_v44  ;;  %v447_v54 = vsel %vm383_vm5, %v351_v35, %v415_v45  ;;  %474 = vst [vmem:[%s808_s16 + $0x40] sm:$0xff] %v442_v49 }
  0x98   : > { %475 = vst [vmem:[%s808_s16 + $0x48] sm:$0xff] %v443_v50  ;;  %v448_v55 = vsel %vm384_vm6, %v352_v36, %v416_v47  ;;  %v449_v56 = vsel %vm385_vm7, %v353_v37, %v417_v48  ;;  %476 = vst [vmem:[%s808_s16 + $0x50] sm:$0xff] %v444_v51  ;;  %v340_v57 = vadd.f32 %v321_v38, %v760_v61  ;;  %vm370_vm8 = vcmp.ge.f32.partialorder %v338_v42, 0.0 }
  0x99   : > { %477 = vst [vmem:[%s808_s16 + $0x58] sm:$0xff] %v445_v52  ;;  %478 = vst [vmem:[%s808_s16 + $0x60] sm:$0xff] %v446_v53  ;;  %v341_v58 = vadd.f32 %v321_v38, %v762_v62  ;;  %v342_v59 = vadd.f32 %v321_v38, %v764_v63  ;;  %v343_v60 = vadd.f32 %v321_v38, %v766_v0  ;;  %vm371_vm9 = vcmp.ge.f32.partialorder %v339_v46, 0.0 }
  0x9a   : > { %479 = vst [vmem:[%s808_s16 + $0x68] sm:$0xff] %v447_v54  ;;  %480 = vst [vmem:[%s808_s16 + $0x70] sm:$0xff] %v448_v55  ;;  %v344_v7 = vadd.f32 %v321_v38, %v768_v1  ;;  %v345_v8 = vadd.f32 %v321_v38, %v770_v2  ;;  %vm372_vm10 = vcmp.ge.f32.partialorder %v340_v57, 0.0  ;;  %v402_v61 = vmul.f32 0.2, %v338_v42  ;;  %v331_v38 = vpop.permute.xlu0 %330 }
  0x9b   : > { %481 = vst [vmem:[%s808_s16 + $0x78] sm:$0xff] %v449_v56  ;;  %vm373_vm11 = vcmp.ge.f32.partialorder %v341_v58, 0.0  ;;  %vm374_vm12 = vcmp.ge.f32.partialorder %v342_v59, 0.0  ;;  %vm375_vm13 = vcmp.ge.f32.partialorder %v343_v60, 0.0  ;;  %v403_v62 = vmul.f32 0.2, %v339_v46 }
  0x9c   : > { %vm376_vm14 = vcmp.ge.f32.partialorder %v344_v7, 0.0  ;;  %vm377_vm15 = vcmp.ge.f32.partialorder %v345_v8, 0.0  ;;  %v404_v63 = vmul.f32 0.2, %v340_v57  ;;  %v362_v0 = vadd.f32 %v336_v13, %v788_v21 }
  0x9d   : > { %v405_v14 = vmul.f32 0.2, %v341_v58  ;;  %v406_v1 = vmul.f32 0.2, %v342_v59  ;;  %v407_v2 = vmul.f32 0.2, %v343_v60  ;;  %v363_v15 = vadd.f32 %v336_v13, %v790_v22 }
  0x9e   : > { %v408_v16 = vmul.f32 0.2, %v344_v7  ;;  %v409_v17 = vmul.f32 0.2, %v345_v8  ;;  %v434_v18 = vsel %vm370_vm8, %v338_v42, %v402_v61  ;;  %v435_v19 = vsel %vm371_vm9, %v339_v46, %v403_v62 }
  0x9f   : > { %v436_v20 = vsel %vm372_vm10, %v340_v57, %v404_v63  ;;  %v437_v21 = vsel %vm373_vm11, %v341_v58, %v405_v14  ;;  %v438_v25 = vsel %vm374_vm12, %v342_v59, %v406_v1  ;;  %v439_v30 = vsel %vm375_vm13, %v343_v60, %v407_v2  ;;  %466 = vst [vmem:[%s808_s16] sm:$0xff] %v434_v18 }
  0xa0   : > { %467 = vst [vmem:[%s808_s16 + $0x8] sm:$0xff] %v435_v19  ;;  %v440_v22 = vsel %vm376_vm14, %v344_v7, %v408_v16  ;;  %v441_v31 = vsel %vm377_vm15, %v345_v8, %v409_v17  ;;  %468 = vst [vmem:[%s808_s16 + $0x10] sm:$0xff] %v436_v20  ;;  %v364_v32 = vadd.f32 %v336_v13, %v792_v23  ;;  %vm394_vm0 = vcmp.ge.f32.partialorder %v362_v0, 0.0 }
  0xa1   : > { %469 = vst [vmem:[%s808_s16 + $0x18] sm:$0xff] %v437_v21  ;;  %470 = vst [vmem:[%s808_s16 + $0x20] sm:$0xff] %v438_v25  ;;  %v365_v33 = vadd.f32 %v336_v13, %v794_v24  ;;  %v366_v34 = vadd.f32 %v336_v13, %v796_v26  ;;  %v367_v35 = vadd.f32 %v336_v13, %v798_v27  ;;  %vm395_vm1 = vcmp.ge.f32.partialorder %v363_v15, 0.0 }
  0xa2   : > { %471 = vst [vmem:[%s808_s16 + $0x28] sm:$0xff] %v439_v30  ;;  %472 = vst [vmem:[%s808_s16 + $0x30] sm:$0xff] %v440_v22  ;;  %v368_v36 = vadd.f32 %v336_v13, %v800_v28  ;;  %v369_v37 = vadd.f32 %v336_v13, %v802_v29  ;;  %vm396_vm2 = vcmp.ge.f32.partialorder %v364_v32, 0.0  ;;  %v426_v23 = vmul.f32 0.2, %v362_v0 }
  0xa3   : > { %473 = vst [vmem:[%s808_s16 + $0x38] sm:$0xff] %v441_v31  ;;  %vm397_vm3 = vcmp.ge.f32.partialorder %v365_v33, 0.0  ;;  %vm398_vm4 = vcmp.ge.f32.partialorder %v366_v34, 0.0  ;;  %vm399_vm5 = vcmp.ge.f32.partialorder %v367_v35, 0.0  ;;  %v427_v24 = vmul.f32 0.2, %v363_v15 }
  0xa4   : > { %vm400_vm6 = vcmp.ge.f32.partialorder %v368_v36, 0.0  ;;  %vm401_vm7 = vcmp.ge.f32.partialorder %v369_v37, 0.0  ;;  %v428_v26 = vmul.f32 0.2, %v364_v32  ;;  %v354_v27 = vadd.f32 %v331_v38, %v772_v3 }
  0xa5   : > { %v429_v39 = vmul.f32 0.2, %v365_v33  ;;  %v430_v28 = vmul.f32 0.2, %v366_v34  ;;  %v431_v29 = vmul.f32 0.2, %v367_v35  ;;  %v355_v40 = vadd.f32 %v331_v38, %v774_v4 }
  0xa6   : > { %v432_v41 = vmul.f32 0.2, %v368_v36  ;;  %v433_v42 = vmul.f32 0.2, %v369_v37  ;;  %v458_v43 = vsel %vm394_vm0, %v362_v0, %v426_v23  ;;  %v459_v44 = vsel %vm395_vm1, %v363_v15, %v427_v24 }
  0xa7   : > { %v460_v45 = vsel %vm396_vm2, %v364_v32, %v428_v26  ;;  %v461_v3 = vsel %vm397_vm3, %v365_v33, %v429_v39  ;;  %v462_v46 = vsel %vm398_vm4, %v366_v34, %v430_v28  ;;  %v463_v47 = vsel %vm399_vm5, %v367_v35, %v431_v29  ;;  %490 = vst [vmem:[%s808_s16 + $0xc0] sm:$0xff] %v458_v43 }
  0xa8   : > { %491 = vst [vmem:[%s808_s16 + $0xc8] sm:$0xff] %v459_v44  ;;  %v464_v4 = vsel %vm400_vm6, %v368_v36, %v432_v41  ;;  %v465_v48 = vsel %vm401_vm7, %v369_v37, %v433_v42  ;;  %492 = vst [vmem:[%s808_s16 + $0xd0] sm:$0xff] %v460_v45  ;;  %v356_v49 = vadd.f32 %v331_v38, %v776_v5  ;;  %vm386_vm8 = vcmp.ge.f32.partialorder %v354_v27, 0.0 }
  0xa9   : > { %493 = vst [vmem:[%s808_s16 + $0xd8] sm:$0xff] %v461_v3  ;;  %494 = vst [vmem:[%s808_s16 + $0xe0] sm:$0xff] %v462_v46  ;;  %v357_v50 = vadd.f32 %v331_v38, %v778_v6  ;;  %v358_v51 = vadd.f32 %v331_v38, %v780_v9  ;;  %v359_v52 = vadd.f32 %v331_v38, %v782_v10  ;;  %vm387_vm9 = vcmp.ge.f32.partialorder %v355_v40, 0.0 }
  0xaa   : > { %495 = vst [vmem:[%s808_s16 + $0xe8] sm:$0xff] %v463_v47  ;;  %496 = vst [vmem:[%s808_s16 + $0xf0] sm:$0xff] %v464_v4  ;;  %v360_v53 = vadd.f32 %v331_v38, %v784_v11  ;;  %v361_v54 = vadd.f32 %v331_v38, %v786_v12  ;;  %vm388_vm10 = vcmp.ge.f32.partialorder %v356_v49, 0.0  ;;  %v418_v5 = vmul.f32 0.2, %v354_v27 }
  0xab   : > { %497 = vst [vmem:[%s808_s16 + $0xf8] sm:$0xff] %v465_v48  ;;  %vm389_vm11 = vcmp.ge.f32.partialorder %v357_v50, 0.0  ;;  %vm390_vm12 = vcmp.ge.f32.partialorder %v358_v51, 0.0  ;;  %vm391_vm13 = vcmp.ge.f32.partialorder %v359_v52, 0.0  ;;  %v419_v6 = vmul.f32 0.2, %v355_v40 }
  0xac   : > { %vm392_vm14 = vcmp.ge.f32.partialorder %v360_v53, 0.0  ;;  %vm393_vm15 = vcmp.ge.f32.partialorder %v361_v54, 0.0  ;;  %v420_v55 = vmul.f32 0.2, %v356_v49  ;;  %v421_v9 = vmul.f32 0.2, %v357_v50 }
  0xad   : > { %v422_v10 = vmul.f32 0.2, %v358_v51  ;;  %v423_v11 = vmul.f32 0.2, %v359_v52  ;;  %v424_v12 = vmul.f32 0.2, %v360_v53  ;;  %v450_v57 = vsel %vm386_vm8, %v354_v27, %v418_v5 }
  0xae   : > { %v425_v56 = vmul.f32 0.2, %v361_v54  ;;  %v451_v58 = vsel %vm387_vm9, %v355_v40, %v419_v6  ;;  %v452_v59 = vsel %vm388_vm10, %v356_v49, %v420_v55  ;;  %v453_v60 = vsel %vm389_vm11, %v357_v50, %v421_v9  ;;  %482 = vst [vmem:[%s808_s16 + $0x80] sm:$0xff] %v450_v57 }
  0xaf   : > { %v454_v7 = vsel %vm390_vm12, %v358_v51, %v422_v10  ;;  %v455_v8 = vsel %vm391_vm13, %v359_v52, %v423_v11  ;;  %483 = vst [vmem:[%s808_s16 + $0x88] sm:$0xff] %v451_v58  ;;  %v456_v13 = vsel %vm392_vm14, %v360_v53, %v424_v12  ;;  %484 = vst [vmem:[%s808_s16 + $0x90] sm:$0xff] %v452_v59 }
  0xb0   : > { %v457_v61 = vsel %vm393_vm15, %v361_v54, %v425_v56  ;;  %485 = vst [vmem:[%s808_s16 + $0x98] sm:$0xff] %v453_v60  ;;  %486 = vst [vmem:[%s808_s16 + $0xa0] sm:$0xff] %v454_v7 }
  0xb1   : > { %487 = vst [vmem:[%s808_s16 + $0xa8] sm:$0xff] %v455_v8  ;;  %488 = vst [vmem:[%s808_s16 + $0xb0] sm:$0xff] %v456_v13 }
  0xb2   : > { %489 = vst [vmem:[%s808_s16 + $0xb8] sm:$0xff] %v457_v61 }
  0xb3 PF: > { %s13_s14 = sadd.s32 1, %s647_s14   ;;  %s909_s12 = smov %s643_s13 }
  0xb4   : > { %p10_p5 = scmp.ge.s32.totalorder %s13_s14, 4   ;;  %s910_s13 = smov %s912_s15 }
  0xb6   :  { %12 = sbr.rel (!%p10_p5) target bundleno = 2 (0x2), region = 62 }

// kernel: cell_spa_forward.2
= control target key start
LH: loop header
LB: loop body
LE: loop exit
PB: predicated region body
PF: predicated region fallthrough
CT: control target
= control target key end

     0   :  { %13 = vsyncpa [#allocation4], 0  ;;  %s4482_s24 = smov 0   ;;  %s4484_s25 = smov 0   ;;  %s5013_s0 = inlined_call_operand.vmem [shape: f32[9], index: 0, kind: input, shape index: {}]   ;;  %s5014_s1 = inlined_call_operand.vmem [shape: f32[2,8,1024], index: 1, kind: input, shape index: {}]   ;;  %s5015_s2 = inlined_call_operand.vmem [shape: f32[2,8,1024], index: 2, kind: input, shape index: {}]   ;;  %s5016_s3 = inlined_call_operand.vmem [shape: f32[72,8], index: 3, kind: input, shape index: {}]   ;;  %s5017_s4 = inlined_call_operand.vmem [shape: f32[32,24], index: 4, kind: input, shape index: {}]   ;;  %s5018_s5 = inlined_call_operand.vmem [shape: bf16[2,32,1024], index: 5, kind: output, shape index: {0}]   ;;  %s5019_s6 = inlined_call_operand.vmem [shape: f32[2,1,32,1], index: 6, kind: output, shape index: {1}]   ;;  %s5020_s7 = inlined_call_operand.vmem [shape: f32[2,1,32,1], index: 7, kind: output, shape index: {2}]  }
   0x1   :  { %s4486_s26 = smov 0  }
   0x2 LB: > { %s4229_s27 = sadd.s32 4294967295, %s4438_s26   ;;  %s31_s28 = sadd.s32 1, %s4434_s25  ;;  %s4438_s26 = sphi %s4486_s26, %s19_s26   ;;  %s4434_s25 = sphi %s4484_s25, %s5045_s25   ;;  %s4430_s24 = sphi %s4482_s24, %s5044_s24  }
   0x3   : > { %p33_p0 = scmp.ge.s32.totalorder %s31_s28, 2  ;;  %p4231_p1 = scmp.ge.s32.totalorder %s4438_s26, 1 }
   0x4   : > { %p239_p2 = scmp.lt.s32.totalorder %s4438_s26, 3  ;;  %p4507_p4 = scmp.eq.s32.totalorder %s4229_s27, 0 }
   0x5   : > { %s5047_s28 = smov (%p33_p0, %s31_s28), 0  ;;  %s252_s10 = sshll.u32 %s5013_s0, 4  ;;  %s253_s10 = int_to_ptr.vmem [resolvable:$true] %s252_s10 }
   0x6   : > { %p4503_p3 = pnand %p4231_p1, %p239_p2  ;;  %s4397_s11 = scalar_lea.vmem %s253_s10, 16 }
   0x7   : > { %p4398_p7 = scmp.ne.s32.totalorder %s253_s10, %s4397_s11  ;;  %p4405_p11 = scmp.lt.s32.totalorder %s253_s10, %s253_s10 }
   0x8   : > { %p4365_p5 = pneg %p4503_p3  ;;  %p4406_p12 = scmp.lt.s32.totalorder %s4397_s11, %s4397_s11 }
   0xa   : > { %p4366_p6 = pnand %p4507_p4, %p4365_p5  ;;  %p4407_p13 = por %p4406_p12, %p4405_p11 }
   0xc   : > { %p4399_p8 = pneg %p4366_p6 }
   0xe   : > { %p4400_p9 = pnand %p4399_p8, %p4398_p7 }
  0x10   : > { %p4401_p10 = pneg %p4400_p9 }
  0x12   : > { %p4408_p0 = pnand %p4407_p13, %p4401_p10 }
  0x14   : > { %4411 = shalt.err (!%p4408_p0)
}
  0x15   : > { %s4440_s12 = smov [#allocation3]   ;;  %297 = sbr.rel (%p4503_p3) target bundleno = 1108 (0x454), region = 40 }
  0x16   : > { %4368 = dma.vmem_to_smem (!%p4366_p6), %s253_s10, 16, %s4440_s12, [#allocation4]  }
  0x1c   : > { %4425 = dma.done.wait (%p4507_p4), [#allocation4], 16  }
  0x1d   : > { %4427 = vsyncadd (%p4507_p4), [#allocation4], 4294967280 }
  0x1e   : > { %303 = sfence }
  0x1f   : > { %p366_p1 = scmp.lt.s32.totalorder %s4430_s24, 1  ;;  %v5021_v0 = vmov 0.0   ;;  %v421_v1 = vld [vmem:[%s5016_s3] sm:$0xff]  ;;  %vm422_vm0 = vcmask 64512   ;;  %v744_v14 = vld [vmem:[%s5016_s3 + $0x8] sm:$0xff]  ;;  %v1082_v19 = vld [vmem:[%s5016_s3 + $0x10] sm:$0xff] }
  0x20   : > { %490 = vmatprep.mubr.f32.mxu0 %v5021_v0  ;;  %561 = vmatprep.mubr.f32.mxu1 %v5021_v0  ;;  %v1404_v20 = vld [vmem:[%s5016_s3 + $0x18] sm:$0xff]  ;;  %s718_s9 = sld [smem:[#allocation3]]  ;;  %s4254_s10 = sld [smem:[#allocation3 + $0x1]]  ;;  %vm3412_vm1 = vcmask 195584   ;;  %vm3929_vm2 = vcmask 7168  }
  0x21   : > { %s5049_s24 = smov (!%p366_p1, %s4430_s24), 1  ;;  %s4259_s19 = sld [smem:[#allocation3 + $0x2]] }
  0x22   : > { %s4324_s13 = sshll.u32 %s5049_s24, 6  ;;  %s4264_s20 = sld [smem:[#allocation3 + $0x3]] }
  0x23   : > { %s373_s16 = scalar_lea.vmem %s5014_s1, %s4324_s13  ;;  %s383_s21 = scalar_lea.vmem %s5015_s2, %s4324_s13 }
  0x24   : > { %v4537_v2 = vld [vmem:[%s373_s16 + $0x8] sm:$0xff]  ;;  %v4539_v3 = vld [vmem:[%s373_s16 + $0x18] sm:$0xff]  ;;  %v4541_v4 = vld [vmem:[%s373_s16] sm:$0xff]  ;;  %s4274_s22 = sld [smem:[#allocation3 + $0x5]]  ;;  %s4795_s23 = sld [smem:[#allocation3 + $0x6]] }
  0x25   : > { %426 = vmatprep.subr.mxu0 %v4537_v2  ;;  %497 = vmatprep.subr.mxu1 %v4539_v3  ;;  %v4545_v5 = vld [vmem:[%s373_s16 + $0x10] sm:$0xff]  ;;  %v4547_v6 = vld [vmem:[%s373_s16 + $0x28] sm:$0xff]  ;;  %v4549_v7 = vld [vmem:[%s373_s16 + $0x38] sm:$0xff]  ;;  %s4809_s27 = sld [smem:[#allocation3 + $0x7]]  ;;  %s4289_s8 = sld [smem:[#allocation3 + $0x8]] }
  0x26   : > { %5031 = vst [vmem:[#allocation6_spill] sm:$0xff] %v4545_v5  ;;  %427 = vmatpush1.msra.mxu0 %v4541_v4  ;;  %498 = vmatpush1.msra.mxu1 %v4545_v5  ;;  %v4553_v8 = vld [vmem:[%s373_s16 + $0x20] sm:$0xff]  ;;  %v4560_v9 = vld [vmem:[%s373_s16 + $0x30] sm:$0xff]  ;;  %v4566_v10 = vld [vmem:[%s383_s21 + $0x8] sm:$0xff]  ;;  %v719_v21 = vstv %s718_s9  ;;  %s4326_s17 = sshll.u32 %s5049_s24, 7 }
  0x27   : > { %5032 = vst [vmem:[#allocation7_spill] sm:$0xff] %v4553_v8  ;;  %4246 = vmatmul.mubr.msk.f32.vlgmr.msra.gmra.mrb[0].mxu0 %vm422_vm0, %v421_v1  ;;  %4247 = vmatmul.mubr.msk.f32.vlgmr.msra.gmra.mrb[0].mxu1 %vm422_vm0, %v421_v1  ;;  %5033 = vst [vmem:[#allocation8_spill] sm:$0xff] %v4560_v9  ;;  %v4568_v11 = vld [vmem:[%s383_s21 + $0x18] sm:$0xff]  ;;  %v4572_v12 = vld [vmem:[%s383_s21] sm:$0xff]  ;;  %v1041_v26 = vstv %s4254_s10  ;;  %v721_v27 = vmul.f32 %v719_v21, %v4537_v2  ;;  %v723_v28 = vmul.f32 %v719_v21, %v4539_v3 }
  0x28   : > { %568 = vmatprep.subr.mxu0 %v4547_v6  ;;  %639 = vmatprep.subr.mxu1 %v4549_v7  ;;  %5034 = vst [vmem:[#allocation9_spill] sm:$0xff] %v4572_v12  ;;  %v4576_v13 = vld [vmem:[%s383_s21 + $0x10] sm:$0xff]  ;;  %v4585_v15 = vld [vmem:[%s383_s21 + $0x28] sm:$0xff]  ;;  %v4587_v16 = vld [vmem:[%s383_s21 + $0x38] sm:$0xff]  ;;  %v720_v29 = vmul.f32 %v719_v21, %v4541_v4  ;;  %v722_v30 = vmul.f32 %v719_v21, %v4545_v5 }
  0x29   : > { %569 = vmatpush1.msra.mxu0 %v4553_v8  ;;  %632 = vmatprep.mubr.f32.mxu0 %v5021_v0  ;;  %5035 = vst [vmem:[#allocation10_spill] sm:$0xff] %v4576_v13  ;;  %v4591_v17 = vld [vmem:[%s383_s21 + $0x20] sm:$0xff]  ;;  %v4595_v18 = vld [vmem:[%s383_s21 + $0x30] sm:$0xff]  ;;  %v725_v31 = vmul.f32 %v719_v21, %v4547_v6  ;;  %v727_v34 = vmul.f32 %v719_v21, %v4549_v7  ;;  %s4269_s21 = sld [smem:[#allocation3 + $0x4]] }
  0x2a   : > { %640 = vmatpush1.msra.mxu1 %v4560_v9  ;;  %703 = vmatprep.mubr.f32.mxu1 %v5021_v0  ;;  %5036 = vst [vmem:[#allocation11_spill] sm:$0xff] %v4591_v17  ;;  %v1043_v35 = vmul.f32 %v1041_v26, %v4566_v10  ;;  %v1045_v40 = vmul.f32 %v1041_v26, %v4568_v11 }
  0x2b   : > { %4248 = vmatmul.mubr.msk.f32.vlgmr.msra.gmra.mrb[2].mxu0 %vm422_vm0, %v421_v1  ;;  %4249 = vmatmul.mubr.msk.f32.vlgmr.msra.gmra.mrb[2].mxu1 %vm422_vm0, %v421_v1  ;;  %v1047_v41 = vmul.f32 %v1041_v26, %v4585_v15  ;;  %v1049_v44 = vmul.f32 %v1041_v26, %v4587_v16  ;;  %v724_v45 = vmul.f32 %v719_v21, %v4553_v8 }
  0x2c   : > { %748 = vmatprep.subr.mxu0 %v4566_v10  ;;  %819 = vmatprep.subr.mxu1 %v4568_v11  ;;  %v1042_v46 = vmul.f32 %v1041_v26, %v4572_v12  ;;  %v1044_v47 = vmul.f32 %v1041_v26, %v4576_v13  ;;  %v726_v49 = vmul.f32 %v719_v21, %v4560_v9 }
  0x2d   : > { %749 = vmatpush1.msra.mxu0 %v4572_v12  ;;  %812 = vmatprep.mubr.f32.mxu0 %v5021_v0  ;;  %v1046_v52 = vmul.f32 %v1041_v26, %v4591_v17  ;;  %v1048_v53 = vmul.f32 %v1041_v26, %v4595_v18 }
  0x2e   : > { %820 = vmatpush1.msra.mxu1 %v4576_v13  ;;  %883 = vmatprep.mubr.f32.mxu1 %v5021_v0 }
  0x2f   : > { %4250 = vmatmul.mubr.msk.f32.vlgmr.msra.gmra.mrb[4].mxu0 %vm422_vm0, %v744_v14  ;;  %4251 = vmatmul.mubr.msk.f32.vlgmr.msra.gmra.mrb[4].mxu1 %vm422_vm0, %v744_v14 }
  0x30   : > { %890 = vmatprep.subr.mxu0 %v4585_v15  ;;  %961 = vmatprep.subr.mxu1 %v4587_v16 }
  0x31   : > { %891 = vmatpush1.msra.mxu0 %v4591_v17  ;;  %954 = vmatprep.mubr.f32.mxu0 %v5021_v0 }
  0x32   : > { %962 = vmatpush1.msra.mxu1 %v4595_v18  ;;  %1025 = vmatprep.mubr.f32.mxu1 %v5021_v0 }
  0x33   : > { %4252 = vmatmul.mubr.msk.f32.vlgmr.msra.gmra.mrb[6].mxu0 %vm422_vm0, %v744_v14  ;;  %4253 = vmatmul.mubr.msk.f32.vlgmr.msra.gmra.mrb[6].mxu1 %vm422_vm0, %v744_v14 }
  0x34   : > { %1086 = vmatprep.subr.mxu0 %v4537_v2  ;;  %1150 = vmatprep.mubr.f32.mxu0 %v5021_v0 }
  0x35   : > { %1087 = vmatpush1.msra.mxu0 %v4541_v4  ;;  %1157 = vmatprep.subr.mxu1 %v4539_v3 }
  0x36   : > { %1228 = vmatprep.subr.mxu0 %v4547_v6  ;;  %1158 = vmatpush1.msra.mxu1 %v4545_v5 }
  0x37   : > { %4255 = vmatmul.mubr.msk.f32.vlgmr.msra.gmra.mrb[8].mxu0 %vm422_vm0, %v1082_v19  ;;  %1221 = vmatprep.mubr.f32.mxu1 %v5021_v0 }
  0x38   : > { %1229 = vmatpush1.msra.mxu0 %v4553_v8  ;;  %1292 = vmatprep.mubr.f32.mxu0 %v5021_v0 }
  0x39   : > { %4256 = vmatmul.mubr.msk.f32.vlgmr.msra.gmra.mrb[8].mxu1 %vm422_vm0, %v1082_v19  ;;  %1299 = vmatprep.subr.mxu1 %v4549_v7 }
  0x3a   : > { %1408 = vmatprep.subr.mxu0 %v4566_v10  ;;  %1300 = vmatpush1.msra.mxu1 %v4560_v9 }
  0x3b   : > { %4257 = vmatmul.mubr.msk.f32.vlgmr.msra.gmra.mrb[10].mxu0 %vm422_vm0, %v1082_v19  ;;  %1363 = vmatprep.mubr.f32.mxu1 %v5021_v0 }
  0x3c   : > { %1409 = vmatpush1.msra.mxu0 %v4572_v12  ;;  %1472 = vmatprep.mubr.f32.mxu0 %v5021_v0 }
  0x3d   : > { %4258 = vmatmul.mubr.msk.f32.vlgmr.msra.gmra.mrb[10].mxu1 %vm422_vm0, %v1082_v19  ;;  %1479 = vmatprep.subr.mxu1 %v4568_v11 }
  0x3e   : > { %1550 = vmatprep.subr.mxu0 %v4585_v15  ;;  %1480 = vmatpush1.msra.mxu1 %v4576_v13 }
  0x3f   : > { %1543 = vmatprep.mubr.f32.mxu1 %v5021_v0  ;;  %1621 = vmatprep.subr.mxu1 %v4587_v16 }
  0x40   : > { %4260 = vmatmul.mubr.msk.f32.vlgmr.msra.gmra.mrb[12].mxu0 %vm422_vm0, %v1404_v20 }
  0x41   : > { %4261 = vmatmul.mubr.msk.f32.vlgmr.msra.gmra.mrb[12].mxu1 %vm422_vm0, %v1404_v20  ;;  %1551 = vmatpush1.msra.mxu0 %v4591_v17 }
  0x42   : > { %1614 = vmatprep.mubr.f32.mxu0 %v5021_v0  ;;  %1622 = vmatpush1.msra.mxu1 %v4595_v18 }
  0x43   : > { %1685 = vmatprep.mubr.f32.mxu1 %v5021_v0 }
  0x44   : > { %4262 = vmatmul.mubr.msk.f32.vlgmr.msra.gmra.mrb[14].mxu0 %vm422_vm0, %v1404_v20 }
  0x45   : > { %4263 = vmatmul.mubr.msk.f32.vlgmr.msra.gmra.mrb[14].mxu1 %vm422_vm0, %v1404_v20  ;;  %1802 = vmatprep.mubr.f32.mxu0 %v5021_v0 }
  0x46   : > { %1873 = vmatprep.mubr.f32.mxu1 %v5021_v0 }
  0xfa   : > { %v492_v22 = vpop.f32.mrb[0].mxu0  ;;  %v563_v23 = vpop.f32.mrb[0].mxu1 }
  0xfb   : > { %v494_v24 = vpop.f32.mrb[1].mxu0  ;;  %v565_v25 = vpop.f32.mrb[1].mxu1  ;;  %v710_v36 = vmax.f32 %v492_v22, 0.0  ;;  %v712_v37 = vmax.f32 %v563_v23, 0.0 }
  0xfc   : > { %v711_v42 = vmax.f32 %v494_v24, 0.0  ;;  %v713_v43 = vmax.f32 %v565_v25, 0.0 }
  0xfd   : > { %v728_v54 = vadd.f32 %v720_v29, %v710_v36  ;;  %v730_v55 = vadd.f32 %v722_v30, %v712_v37 }
  0xfe   : > { %v634_v32 = vpop.f32.mrb[2].mxu0  ;;  %v705_v33 = vpop.f32.mrb[2].mxu1  ;;  %v729_v60 = vadd.f32 %v721_v27, %v711_v42  ;;  %v731_v61 = vadd.f32 %v723_v28, %v713_v43 }
  0xff   : > { %v636_v38 = vpop.f32.mrb[3].mxu0  ;;  %v707_v39 = vpop.f32.mrb[3].mxu1  ;;  %v714_v48 = vmax.f32 %v634_v32, 0.0  ;;  %v716_v14 = vmax.f32 %v705_v33, 0.0 }
 0x100   : > { %v715_v1 = vmax.f32 %v636_v38, 0.0  ;;  %v717_v22 = vmax.f32 %v707_v39, 0.0 }
 0x101   : > { %v732_v21 = vadd.f32 %v724_v45, %v714_v48  ;;  %v734_v39 = vadd.f32 %v726_v49, %v716_v14  ;;  %v1734_v45 = vld [vmem:[%s5016_s3 + $0x20] sm:$0xff] }
 0x102   : > { %v814_v50 = vpop.f32.mrb[4].mxu0  ;;  %v885_v51 = vpop.f32.mrb[4].mxu1  ;;  %v733_v43 = vadd.f32 %v725_v31, %v715_v1 }
 0x103   : > { %v1032_v56 = vmax.f32 %v814_v50, 0.0  ;;  %v1034_v57 = vmax.f32 %v885_v51, 0.0  ;;  %v816_v58 = vpop.f32.mrb[5].mxu0  ;;  %v887_v59 = vpop.f32.mrb[5].mxu1 }
 0x104   : > { %v1033_v62 = vmax.f32 %v816_v58, 0.0  ;;  %v1035_v63 = vmax.f32 %v887_v59, 0.0  ;;  %v2394_v58 = vld [vmem:[%s5016_s3 + $0x30] sm:$0xff]  ;;  %v2724_v59 = vld [vmem:[%s5016_s3 + $0x38] sm:$0xff] }
 0x105   : > { %v1050_v19 = vadd.f32 %v1042_v46, %v1032_v56  ;;  %v1052_v20 = vadd.f32 %v1044_v47, %v1034_v57  ;;  %v735_v46 = vadd.f32 %v727_v34, %v717_v22  ;;  %v2072_v56 = vld [vmem:[%s5016_s3 + $0x28] sm:$0xff] }
 0x106   : > { %v1051_v23 = vadd.f32 %v1043_v35, %v1033_v62  ;;  %v1053_v24 = vadd.f32 %v1045_v40, %v1035_v63  ;;  %v956_v25 = vpop.f32.mrb[6].mxu0  ;;  %v1027_v26 = vpop.f32.mrb[6].mxu1 }
 0x107   : > { %v4661_v29 = vadd.f32 %v1050_v19, %v728_v54  ;;  %v4663_v30 = vadd.f32 %v1052_v20, %v730_v55  ;;  %v1036_v32 = vmax.f32 %v956_v25, 0.0  ;;  %v1038_v36 = vmax.f32 %v1027_v26, 0.0  ;;  %v958_v27 = vpop.f32.mrb[7].mxu0  ;;  %v1029_v28 = vpop.f32.mrb[7].mxu1 }
 0x108   : > { %v4665_v37 = vadd.f32 %v1051_v23, %v729_v60  ;;  %v4667_v38 = vadd.f32 %v1053_v24, %v731_v61  ;;  %v1037_v33 = vmax.f32 %v958_v27, 0.0  ;;  %v1039_v42 = vmax.f32 %v1029_v28, 0.0 }
 0x109   : > { %v1054_v35 = vadd.f32 %v1046_v52, %v1036_v32  ;;  %v1056_v40 = vadd.f32 %v1048_v53, %v1038_v36  ;;  %v1379_v60 = vstv %s4259_s19  ;;  %v1701_v61 = vstv %s4264_s20  ;;  %s4971_s20 = scalar_lea.vmem %s5018_s5, %s4326_s17 }
 0x10a   : > { %v1055_v47 = vadd.f32 %v1047_v41, %v1037_v33  ;;  %v1057_v48 = vadd.f32 %v1049_v44, %v1039_v42  ;;  %1738 = vmatprep.subr.mxu0 %v4665_v37  ;;  %1809 = vmatprep.subr.mxu1 %v4667_v38  ;;  %v4674_v50 = vpop.f32.mrb[8].mxu0  ;;  %v1381_v62 = vmul.f32 %v1379_v60, %v4537_v2 }
 0x10b   : > { %v4676_v51 = vadd.f32 %v1054_v35, %v732_v21  ;;  %v4678_v54 = vadd.f32 %v1056_v40, %v734_v39  ;;  %1739 = vmatpush1.msra.mxu0 %v4661_v29  ;;  %1810 = vmatpush1.msra.mxu1 %v4663_v30  ;;  %v4682_v31 = vpop.f32.mrb[9].mxu0  ;;  %v1383_v63 = vmul.f32 %v1379_v60, %v4539_v3  ;;  %v1370_v23 = vmax.f32 %v4674_v50, 0.0 }
 0x10c   : > { %v4684_v49 = vadd.f32 %v1055_v47, %v733_v43  ;;  %v4686_v34 = vadd.f32 %v1057_v48, %v735_v46  ;;  %4265 = vmatmul.mubr.msk.f32.vlgmr.msra.gmra.mrb[16].mxu0 %vm422_vm0, %v1734_v45  ;;  %4266 = vmatmul.mubr.msk.f32.vlgmr.msra.gmra.mrb[16].mxu1 %vm422_vm0, %v1734_v45  ;;  %v4690_v41 = vpop.f32.mrb[8].mxu1  ;;  %v1385_v1 = vmul.f32 %v1379_v60, %v4547_v6  ;;  %v1371_v32 = vmax.f32 %v4682_v31, 0.0 }
 0x10d   : > { %1944 = vmatprep.mubr.f32.mxu0 %v5021_v0  ;;  %2015 = vmatprep.mubr.f32.mxu1 %v5021_v0  ;;  %v4694_v44 = vpop.f32.mrb[9].mxu1  ;;  %v1387_v14 = vmul.f32 %v1379_v60, %v4549_v7  ;;  %v1703_v19 = vmul.f32 %v1701_v61, %v4566_v10  ;;  %v1705_v20 = vmul.f32 %v1701_v61, %v4568_v11  ;;  %v1372_v25 = vmax.f32 %v4690_v41, 0.0 }
 0x10e   : > { %1880 = vmatprep.subr.mxu0 %v4684_v49  ;;  %1951 = vmatprep.subr.mxu1 %v4686_v34  ;;  %v4698_v52 = vpop.f32.mrb[10].mxu0  ;;  %v1707_v21 = vmul.f32 %v1701_v61, %v4585_v15  ;;  %v1709_v22 = vmul.f32 %v1701_v61, %v4587_v16  ;;  %v1380_v24 = vmul.f32 %v1379_v60, %v4541_v4  ;;  %v1373_v28 = vmax.f32 %v4694_v44, 0.0 }
 0x10f   : > { %1881 = vmatpush1.msra.mxu0 %v4676_v51  ;;  %1952 = vmatpush1.msra.mxu1 %v4678_v54  ;;  %v4702_v53 = vpop.f32.mrb[11].mxu0  ;;  %v1382_v26 = vmul.f32 %v1379_v60, %v4545_v5  ;;  %v1384_v36 = vmul.f32 %v1379_v60, %v4553_v8  ;;  %v1702_v27 = vmul.f32 %v1701_v61, %v4572_v12  ;;  %v1374_v33 = vmax.f32 %v4698_v52, 0.0 }
 0x110   : > { %4267 = vmatmul.mubr.msk.f32.vlgmr.msra.gmra.mrb[18].mxu0 %vm422_vm0, %v1734_v45  ;;  %4268 = vmatmul.mubr.msk.f32.vlgmr.msra.gmra.mrb[18].mxu1 %vm422_vm0, %v1734_v45  ;;  %v4706_v55 = vpop.f32.mrb[10].mxu1  ;;  %v1375_v42 = vmax.f32 %v4702_v53, 0.0  ;;  %v1386_v43 = vmul.f32 %v1379_v60, %v4560_v9  ;;  %v1704_v39 = vmul.f32 %v1701_v61, %v4576_v13  ;;  %v1706_v47 = vmul.f32 %v1701_v61, %v4591_v17 }
 0x111   : > { %2076 = vmatprep.subr.mxu0 %v4537_v2  ;;  %2147 = vmatprep.subr.mxu1 %v4539_v3  ;;  %v4713_v57 = vpop.f32.mrb[11].mxu1  ;;  %v1376_v40 = vmax.f32 %v4706_v55, 0.0  ;;  %v1708_v48 = vmul.f32 %v1701_v61, %v4595_v18  ;;  %v1388_v50 = vadd.f32 %v1380_v24, %v1370_v23  ;;  %v1390_v31 = vadd.f32 %v1382_v26, %v1372_v25 }
 0x112   : > { %2077 = vmatpush1.msra.mxu0 %v4541_v4  ;;  %2140 = vmatprep.mubr.f32.mxu0 %v5021_v0  ;;  %v1377_v45 = vmax.f32 %v4713_v57, 0.0 }
 0x113   : > { %2148 = vmatpush1.msra.mxu1 %v4545_v5  ;;  %2211 = vmatprep.mubr.f32.mxu1 %v5021_v0  ;;  %v1474_v35 = vpop.f32.mrb[12].mxu0 }
 0x114   : > { %4270 = vmatmul.mubr.msk.f32.vlgmr.msra.gmra.mrb[20].mxu0 %vm422_vm0, %v2072_v56  ;;  %4271 = vmatmul.mubr.msk.f32.vlgmr.msra.gmra.mrb[20].mxu1 %vm422_vm0, %v2072_v56  ;;  %v1545_v46 = vpop.f32.mrb[12].mxu1  ;;  %v1692_v41 = vmax.f32 %v1474_v35, 0.0  ;;  %v1476_v44 = vpop.f32.mrb[13].mxu0 }
 0x115   : > { %2218 = vmatprep.subr.mxu0 %v4547_v6  ;;  %2289 = vmatprep.subr.mxu1 %v4549_v7  ;;  %v1694_v52 = vmax.f32 %v1545_v46, 0.0  ;;  %v1547_v53 = vpop.f32.mrb[13].mxu1 }
 0x116   : > { %2219 = vmatpush1.msra.mxu0 %v4553_v8  ;;  %2282 = vmatprep.mubr.f32.mxu0 %v5021_v0  ;;  %v1695_v60 = vmax.f32 %v1547_v53, 0.0  ;;  %v1710_v55 = vadd.f32 %v1702_v27, %v1692_v41  ;;  %v1395_v8 = vadd.f32 %v1387_v14, %v1377_v45 }
 0x117   : > { %2290 = vmatpush1.msra.mxu1 %v4560_v9  ;;  %2353 = vmatprep.mubr.f32.mxu1 %v5021_v0  ;;  %v1394_v9 = vadd.f32 %v1386_v43, %v1376_v40 }
 0x118   : > { %4272 = vmatmul.mubr.msk.f32.vlgmr.msra.gmra.mrb[22].mxu0 %vm422_vm0, %v2072_v56  ;;  %4273 = vmatmul.mubr.msk.f32.vlgmr.msra.gmra.mrb[22].mxu1 %vm422_vm0, %v2072_v56  ;;  %v1389_v56 = vadd.f32 %v1381_v62, %v1371_v32  ;;  %v1713_v5 = vadd.f32 %v1705_v20, %v1695_v60  ;;  %v1687_v61 = vpop.f32.mrb[14].mxu1  ;;  %v1718_v23 = vadd.f32 %v1710_v55, %v1388_v50  ;;  %v2031_v20 = vstv %s4269_s21  ;;  %s4327_s21 = sshll.u32 %s5049_s24, 5 }
 0x119   : > { %2398 = vmatprep.subr.mxu0 %v4566_v10  ;;  %2469 = vmatprep.subr.mxu1 %v4568_v11  ;;  %v1698_v35 = vmax.f32 %v1687_v61, 0.0  ;;  %v1689_v46 = vpop.f32.mrb[15].mxu1  ;;  %v2032_v40 = vmul.f32 %v2031_v20, %v4661_v29  ;;  %v2038_v41 = vmul.f32 %v2031_v20, %v4678_v54 }
 0x11a   : > { %2399 = vmatpush1.msra.mxu0 %v4572_v12  ;;  %2470 = vmatpush1.msra.mxu1 %v4576_v13  ;;  %v1393_v13 = vadd.f32 %v1385_v1, %v1375_v42  ;;  %v1712_v12 = vadd.f32 %v1704_v39, %v1694_v52 }
 0x11b   : > { %2462 = vmatprep.mubr.f32.mxu0 %v5021_v0  ;;  %2533 = vmatprep.mubr.f32.mxu1 %v5021_v0  ;;  %v1716_v1 = vadd.f32 %v1708_v48, %v1698_v35 }
 0x11c   : > { %2540 = vmatprep.subr.mxu0 %v4585_v15  ;;  %2611 = vmatprep.subr.mxu1 %v4587_v16  ;;  %v1720_v24 = vadd.f32 %v1712_v12, %v1390_v31  ;;  %v4793_v12 = vstv %s4274_s22  ;;  %v2036_v31 = vmul.f32 %v2031_v20, %v4676_v51 }
 0x11d   : > { %4275 = vmatmul.mubr.msk.f32.vlgmr.msra.gmra.mrb[24].mxu0 %vm422_vm0, %v2394_v58  ;;  %4276 = vmatmul.mubr.msk.f32.vlgmr.msra.gmra.mrb[24].mxu1 %vm422_vm0, %v2394_v58  ;;  %v1724_v42 = vadd.f32 %v1716_v1, %v1394_v9 }
 0x11e   : > { %2541 = vmatpush1.msra.mxu0 %v4591_v17  ;;  %2612 = vmatpush1.msra.mxu1 %v4595_v18  ;;  %v1616_v17 = vpop.f32.mrb[14].mxu0 }
 0x11f   : > { %2728 = vmatprep.subr.mxu0 %v4665_v37  ;;  %2799 = vmatprep.subr.mxu1 %v4667_v38  ;;  %v1696_v25 = vmax.f32 %v1616_v17, 0.0  ;;  %v1618_v26 = vpop.f32.mrb[15].mxu0 }
 0x120   : > { %2604 = vmatprep.mubr.f32.mxu0 %v5021_v0  ;;  %2675 = vmatprep.mubr.f32.mxu1 %v5021_v0  ;;  %v1697_v32 = vmax.f32 %v1618_v26, 0.0 }
 0x121   : > { %4277 = vmatmul.mubr.msk.f32.vlgmr.msra.gmra.mrb[26].mxu0 %vm422_vm0, %v2394_v58  ;;  %4278 = vmatmul.mubr.msk.f32.vlgmr.msra.gmra.mrb[26].mxu1 %vm422_vm0, %v2394_v58  ;;  %v1391_v58 = vadd.f32 %v1383_v63, %v1373_v28  ;;  %v1699_v28 = vmax.f32 %v1689_v46, 0.0 }
 0x122   : > { %2729 = vmatpush1.msra.mxu0 %v4661_v29  ;;  %2800 = vmatpush1.msra.mxu1 %v4663_v30  ;;  %v1715_v27 = vadd.f32 %v1707_v21, %v1697_v32  ;;  %v2034_v21 = vmul.f32 %v2031_v20, %v4663_v30 }
 0x123   : > { %2870 = vmatprep.subr.mxu0 %v4684_v49  ;;  %2941 = vmatprep.subr.mxu1 %v4686_v34  ;;  %v1721_v63 = vadd.f32 %v1713_v5, %v1391_v58  ;;  %v2037_v58 = vmul.f32 %v2031_v20, %v4684_v49 }
 0x124   : > { %2792 = vmatprep.mubr.f32.mxu0 %v5021_v0  ;;  %2863 = vmatprep.mubr.f32.mxu1 %v5021_v0  ;;  %v1723_v14 = vadd.f32 %v1715_v27, %v1393_v13  ;;  %v2691_v27 = vstv %s4795_s23 }
 0x125   : > { %4280 = vmatmul.mubr.msk.f32.vlgmr.msra.gmra.mrb[28].mxu0 %vm422_vm0, %v2724_v59  ;;  %4281 = vmatmul.mubr.msk.f32.vlgmr.msra.gmra.mrb[28].mxu1 %vm422_vm0, %v2724_v59 }
 0x126   : > { %2871 = vmatpush1.msra.mxu0 %v4676_v51  ;;  %2942 = vmatpush1.msra.mxu1 %v4678_v54 }
 0x127   : > { %2934 = vmatprep.mubr.f32.mxu0 %v5021_v0  ;;  %3005 = vmatprep.mubr.f32.mxu1 %v5021_v0 }
 0x129   : > { %4282 = vmatmul.mubr.msk.f32.vlgmr.msra.gmra.mrb[30].mxu0 %vm422_vm0, %v2724_v59  ;;  %4283 = vmatmul.mubr.msk.f32.vlgmr.msra.gmra.mrb[30].mxu1 %vm422_vm0, %v2724_v59  ;;  %v1693_v59 = vmax.f32 %v1476_v44, 0.0 }
 0x12a   : > { %3122 = vmatprep.mubr.f32.mxu0 %v5021_v0  ;;  %3193 = vmatprep.mubr.f32.mxu1 %v5021_v0  ;;  %v1392_v0 = vadd.f32 %v1384_v36, %v1374_v33  ;;  %v1714_v36 = vadd.f32 %v1706_v47, %v1696_v25  ;;  %v1717_v33 = vadd.f32 %v1709_v22, %v1699_v28 }
 0x12b   : > { %v1711_v57 = vadd.f32 %v1703_v19, %v1693_v59  ;;  %v2035_v47 = vmul.f32 %v2031_v20, %v4667_v38  ;;  %v2039_v59 = vmul.f32 %v2031_v20, %v4686_v34 }
 0x12c   : > { %v1722_v19 = vadd.f32 %v1714_v36, %v1392_v0  ;;  %v1725_v43 = vadd.f32 %v1717_v33, %v1395_v8  ;;  %v2033_v8 = vmul.f32 %v2031_v20, %v4665_v37 }
 0x12d   : > { %v1719_v62 = vadd.f32 %v1711_v57, %v1389_v56 }
 0x1df   : > { %v1804_v17 = vpop.f32.mrb[16].mxu0  ;;  %v1875_v39 = vpop.f32.mrb[16].mxu1 }
 0x1e0   : > { %v2022_v5 = vmax.f32 %v1804_v17, 0.0  ;;  %v2024_v45 = vmax.f32 %v1875_v39, 0.0  ;;  %v1806_v22 = vpop.f32.mrb[17].mxu0  ;;  %v1877_v0 = vpop.f32.mrb[17].mxu1  ;;  %v4827_v17 = vmul.f32 %v4793_v12, %v4539_v3 }
 0x1e1   : > { %v2023_v9 = vmax.f32 %v1806_v22, 0.0  ;;  %v2025_v13 = vmax.f32 %v1877_v0, 0.0  ;;  %v2695_v22 = vmul.f32 %v2691_v27, %v4568_v11  ;;  %v5037_v0 = vmov 0.0  }
 0x1e2   : > { %v2040_v48 = vadd.f32 %v2032_v40, %v2022_v5  ;;  %v2042_v50 = vadd.f32 %v2034_v21, %v2024_v45  ;;  %v4837_v45 = vmul.f32 %v4793_v12, %v4547_v6  ;;  %v2693_v21 = vmul.f32 %v2691_v27, %v4566_v10 }
 0x1e3   : > { %v2041_v44 = vadd.f32 %v2033_v8, %v2023_v9  ;;  %v2043_v52 = vadd.f32 %v2035_v47, %v2025_v13  ;;  %v1946_v53 = vpop.f32.mrb[18].mxu0  ;;  %v2017_v56 = vpop.f32.mrb[18].mxu1  ;;  %v4852_v6 = vmul.f32 %v2691_v27, %v4585_v15  ;;  %v4870_v47 = vstv %s4809_s27  ;;  %s403_s27 = scalar_lea.vmem %s5019_s6, %s4327_s21 }
 0x1e4   : > { %v4805_v60 = vadd.f32 %v2040_v48, %v1718_v23  ;;  %v4807_v55 = vadd.f32 %v2042_v50, %v1720_v24  ;;  %v2026_v57 = vmax.f32 %v1946_v53, 0.0  ;;  %v2028_v61 = vmax.f32 %v2017_v56, 0.0  ;;  %v1948_v25 = vpop.f32.mrb[19].mxu0  ;;  %v2019_v26 = vpop.f32.mrb[19].mxu1  ;;  %v3054_v23 = vld [vmem:[%s5016_s3 + $0x40] sm:$0xff]  ;;  %v5040_v56 = vld [vmem:[#allocation8_spill] sm:$0xff] }
 0x1e5   : > { %v2027_v35 = vmax.f32 %v1948_v25, 0.0  ;;  %v2029_v46 = vmax.f32 %v2019_v26, 0.0  ;;  %v4811_v32 = vadd.f32 %v2041_v44, %v1719_v62  ;;  %v4813_v28 = vadd.f32 %v2043_v52, %v1721_v63  ;;  %v5039_v52 = vld [vmem:[#allocation7_spill] sm:$0xff]  ;;  %v5042_v26 = vld [vmem:[#allocation10_spill] sm:$0xff] }
 0x1e6   : > { %v2044_v36 = vadd.f32 %v2036_v31, %v2026_v57  ;;  %v2046_v1 = vadd.f32 %v2038_v41, %v2028_v61  ;;  %v4820_v24 = vmul.f32 %v4793_v12, %v4537_v2  ;;  %v4351_v48 = vpack.c.bf16 %v4807_v55, %v4663_v30  ;;  %v5041_v61 = vld [vmem:[#allocation9_spill] sm:$0xff] }
 0x1e7   : > { %v2045_v33 = vadd.f32 %v2037_v58, %v2027_v35  ;;  %v2047_v20 = vadd.f32 %v2039_v59, %v2029_v46  ;;  %3058 = vmatprep.subr.mxu0 %v4811_v32  ;;  %3129 = vmatprep.subr.mxu1 %v4813_v28  ;;  %v2142_v62 = vpop.f32.mrb[20].mxu0  ;;  %v2213_v63 = vpop.f32.mrb[20].mxu1  ;;  %v4345_v15 = vpack.c.bf16 %v4811_v32, %v4665_v37 }
 0x1e8   : > { %v4829_v39 = vadd.f32 %v2044_v36, %v1722_v19  ;;  %v4831_v5 = vadd.f32 %v2046_v1, %v1724_v42  ;;  %3059 = vmatpush1.msra.mxu0 %v4805_v60  ;;  %3130 = vmatpush1.msra.mxu1 %v4807_v55  ;;  %v2144_v2 = vpop.f32.mrb[21].mxu0  ;;  %v2215_v40 = vpop.f32.mrb[21].mxu1  ;;  %v2377_v42 = vmul.f32 %v4793_v12, %v4549_v7  ;;  %v2360_v50 = vmax.f32 %v2142_v62, 0.0 }
 0x1e9   : > { %4285 = vmatmul.mubr.msk.f32.vlgmr.msra.gmra.mrb[32].mxu0 %vm422_vm0, %v3054_v23  ;;  %4286 = vmatmul.mubr.msk.f32.vlgmr.msra.gmra.mrb[32].mxu1 %vm422_vm0, %v3054_v23  ;;  %v4841_v3 = vadd.f32 %v2045_v33, %v1723_v14  ;;  %v4843_v19 = vadd.f32 %v2047_v20, %v1725_v43  ;;  %v4855_v14 = vmul.f32 %v2691_v27, %v4587_v16  ;;  %v5038_v43 = vld [vmem:[#allocation6_spill] sm:$0xff]  ;;  %v2362_v31 = vmax.f32 %v2213_v63, 0.0  ;;  %v5043_v33 = vld [vmem:[#allocation11_spill] sm:$0xff] }
 0x1ea   : > { %3264 = vmatprep.mubr.f32.mxu0 %v5037_v0  ;;  %3335 = vmatprep.mubr.f32.mxu1 %v5037_v0  ;;  %v2370_v7 = vmul.f32 %v4793_v12, %v4541_v4  ;;  %v4349_v16 = vpack.c.bf16 %v4813_v28, %v4667_v38  ;;  %v2372_v9 = vmul.f32 %v4793_v12, %v5038_v43  ;;  %v2361_v41 = vmax.f32 %v2144_v2, 0.0 }
 0x1eb   : > { %3200 = vmatprep.subr.mxu0 %v4841_v3  ;;  %3271 = vmatprep.subr.mxu1 %v4843_v19  ;;  %v2284_v10 = vpop.f32.mrb[22].mxu0  ;;  %v2355_v11 = vpop.f32.mrb[22].mxu1  ;;  %v4347_v4 = vpack.c.bf16 %v4805_v60, %v4661_v29  ;;  %v2363_v44 = vmax.f32 %v2215_v40, 0.0  ;;  %v2374_v53 = vmul.f32 %v4793_v12, %v5039_v52  ;;  %v2376_v58 = vmul.f32 %v4793_v12, %v5040_v56 }
 0x1ec   : > { %3201 = vmatpush1.msra.mxu0 %v4829_v39  ;;  %3272 = vmatpush1.msra.mxu1 %v4831_v5  ;;  %v2286_v8 = vpop.f32.mrb[23].mxu0  ;;  %v2357_v13 = vpop.f32.mrb[23].mxu1  ;;  %v2364_v59 = vmax.f32 %v2284_v10, 0.0  ;;  %v2366_v57 = vmax.f32 %v2355_v11, 0.0  ;;  %v2692_v25 = vmul.f32 %v2691_v27, %v5041_v61  ;;  %v2694_v35 = vmul.f32 %v2691_v27, %v5042_v26 }
 0x1ed   : > { %4287 = vmatmul.mubr.msk.f32.vlgmr.msra.gmra.mrb[34].mxu0 %vm422_vm0, %v3054_v23  ;;  %4288 = vmatmul.mubr.msk.f32.vlgmr.msra.gmra.mrb[34].mxu1 %vm422_vm0, %v3054_v23  ;;  %v2365_v46 = vmax.f32 %v2286_v8, 0.0  ;;  %v2367_v36 = vmax.f32 %v2357_v13, 0.0  ;;  %v2696_v20 = vmul.f32 %v2691_v27, %v5043_v33  ;;  %v2698_v62 = vmul.f32 %v2691_v27, %v4595_v18 }
 0x1ee   : > { %4346 = vmatprep.subr.bf16.mxu0 %v4345_v15  ;;  %4350 = vmatprep.subr.bf16.mxu1 %v4349_v16  ;;  %v2378_v12 = vadd.f32 %v2370_v7, %v2360_v50  ;;  %v2380_v63 = vadd.f32 %v2372_v9, %v2362_v31  ;;  %v2379_v15 = vadd.f32 %v4820_v24, %v2361_v41 }
 0x1ef   : > { %4348 = vmatpush1.bf16.msra.mxu0 %v4347_v4  ;;  %4352 = vmatpush1.bf16.msra.mxu1 %v4351_v48  ;;  %v2381_v16 = vadd.f32 %v4827_v17, %v2363_v44  ;;  %v2382_v13 = vadd.f32 %v2374_v53, %v2364_v59  ;;  %v2384_v4 = vadd.f32 %v2376_v58, %v2366_v57 }
 0x1f0   : > { %v2464_v1 = vpop.f32.mrb[24].mxu0  ;;  %v2535_v23 = vpop.f32.mrb[24].mxu1  ;;  %3489 = vmatprep.mubr.f32.mxu0 %v5037_v0  ;;  %3578 = vmatprep.mubr.f32.mxu1 %v5037_v0  ;;  %v2383_v27 = vadd.f32 %v4837_v45, %v2365_v46  ;;  %v2385_v52 = vadd.f32 %v2377_v42, %v2367_v36  ;;  %v3022_v45 = vmul.f32 %v4870_v47, %v4661_v29 }
 0x1f1   : > { %v2682_v2 = vmax.f32 %v2464_v1, 0.0  ;;  %v2684_v40 = vmax.f32 %v2535_v23, 0.0  ;;  %v2466_v10 = vpop.f32.mrb[25].mxu0  ;;  %v2537_v11 = vpop.f32.mrb[25].mxu1  ;;  %v3024_v42 = vmul.f32 %v4870_v47, %v4663_v30  ;;  %v3025_v46 = vmul.f32 %v4870_v47, %v4667_v38 }
 0x1f2   : > { %v2683_v43 = vmax.f32 %v2466_v10, 0.0  ;;  %v2685_v8 = vmax.f32 %v2537_v11, 0.0  ;;  %v3026_v10 = vmul.f32 %v4870_v47, %v4676_v51 }
 0x1f3   : > { %v2700_v48 = vadd.f32 %v2692_v25, %v2682_v2  ;;  %v2702_v18 = vadd.f32 %v2694_v35, %v2684_v40  ;;  %v3023_v35 = vmul.f32 %v4870_v47, %v4665_v37  ;;  %v3028_v37 = vmul.f32 %v4870_v47, %v4678_v54 }
 0x1f4   : > { %v2701_v56 = vadd.f32 %v2693_v21, %v2683_v43  ;;  %v2703_v7 = vadd.f32 %v2695_v22, %v2685_v8  ;;  %v2606_v9 = vpop.f32.mrb[26].mxu0  ;;  %v2677_v50 = vpop.f32.mrb[26].mxu1  ;;  %v3027_v43 = vmul.f32 %v4870_v47, %v4684_v49  ;;  %v3029_v8 = vmul.f32 %v4870_v47, %v4686_v34 }
 0x1f5   : > { %v2708_v31 = vadd.f32 %v2700_v48, %v2378_v12  ;;  %v2710_v61 = vadd.f32 %v2702_v18, %v2380_v63  ;;  %v2686_v26 = vmax.f32 %v2606_v9, 0.0  ;;  %v2688_v1 = vmax.f32 %v2677_v50, 0.0  ;;  %v2608_v24 = vpop.f32.mrb[27].mxu0  ;;  %v2679_v41 = vpop.f32.mrb[27].mxu1 }
 0x1f6   : > { %v2709_v17 = vadd.f32 %v2701_v56, %v2379_v15  ;;  %v2711_v44 = vadd.f32 %v2703_v7, %v2381_v16  ;;  %v2687_v23 = vmax.f32 %v2608_v24, 0.0  ;;  %v2689_v53 = vmax.f32 %v2679_v41, 0.0 }
 0x1f7   : > { %v2704_v58 = vadd.f32 %v2696_v20, %v2686_v26  ;;  %v2706_v59 = vadd.f32 %v2698_v62, %v2688_v1  ;;  %v3351_v47 = vstv %s4289_s8  ;;  %s412_s8 = scalar_lea.vmem %s5020_s7, %s4327_s21 }
 0x1f8   : > { %v2705_v21 = vadd.f32 %v4852_v6, %v2687_v23  ;;  %v2707_v22 = vadd.f32 %v4855_v14, %v2689_v53  ;;  %v2794_v57 = vpop.f32.mrb[28].mxu0  ;;  %v2865_v25 = vpop.f32.mrb[28].mxu1 }
 0x1f9   : > { %v2712_v36 = vadd.f32 %v2704_v58, %v2382_v13  ;;  %v2714_v33 = vadd.f32 %v2706_v59, %v2384_v4  ;;  %v3012_v20 = vmax.f32 %v2794_v57, 0.0  ;;  %v3014_v62 = vmax.f32 %v2865_v25, 0.0  ;;  %v2796_v29 = vpop.f32.mrb[29].mxu0  ;;  %v2867_v12 = vpop.f32.mrb[29].mxu1 }
 0x1fa   : > { %v2713_v63 = vadd.f32 %v2705_v21, %v2383_v27  ;;  %v2715_v30 = vadd.f32 %v2707_v22, %v2385_v52  ;;  %v3013_v2 = vmax.f32 %v2796_v29, 0.0  ;;  %v3015_v6 = vmax.f32 %v2867_v12, 0.0 }
 0x1fb   : > { %v3030_v40 = vadd.f32 %v3022_v45, %v3012_v20  ;;  %v3032_v14 = vadd.f32 %v3024_v42, %v3014_v62  ;;  %v3352_v42 = vmul.f32 %v3351_v47, %v4805_v60  ;;  %v3353_v25 = vmul.f32 %v3351_v47, %v4811_v32 }
 0x1fc   : > { %v3031_v11 = vadd.f32 %v3023_v35, %v3013_v2  ;;  %v3033_v38 = vadd.f32 %v3025_v46, %v3015_v6  ;;  %v2936_v15 = vpop.f32.mrb[30].mxu0  ;;  %v3007_v16 = vpop.f32.mrb[30].mxu1  ;;  %v3355_v46 = vmul.f32 %v3351_v47, %v4813_v28  ;;  %v3356_v20 = vmul.f32 %v3351_v47, %v4829_v39 }
 0x1fd   : > { %v3038_v13 = vadd.f32 %v3030_v40, %v2708_v31  ;;  %v3040_v4 = vadd.f32 %v3032_v14, %v2710_v61  ;;  %v3016_v48 = vmax.f32 %v2936_v15, 0.0  ;;  %v3018_v18 = vmax.f32 %v3007_v16, 0.0  ;;  %v2938_v27 = vpop.f32.mrb[31].mxu0  ;;  %v3009_v52 = vpop.f32.mrb[31].mxu1 }
 0x1fe   : > { %v3039_v56 = vadd.f32 %v3031_v11, %v2709_v17  ;;  %v3041_v7 = vadd.f32 %v3033_v38, %v2711_v44  ;;  %v3017_v9 = vmax.f32 %v2938_v27, 0.0  ;;  %v3019_v50 = vmax.f32 %v3009_v52, 0.0 }
 0x1ff   : > { %v3034_v26 = vadd.f32 %v3026_v10, %v3016_v48  ;;  %v3036_v1 = vadd.f32 %v3028_v37, %v3018_v18  ;;  %v3354_v17 = vmul.f32 %v3351_v47, %v4807_v55  ;;  %v3358_v62 = vmul.f32 %v3351_v47, %v4831_v5 }
 0x200   : > { %v3035_v24 = vadd.f32 %v3027_v43, %v3017_v9  ;;  %v3037_v41 = vadd.f32 %v3029_v8, %v3019_v50  ;;  %v3357_v55 = vmul.f32 %v3351_v47, %v4841_v3  ;;  %v3384_v43 = vld [vmem:[%s5017_s4] sm:$0xff]  ;;  %v4353_v8 = vpack.c.bf16 %v4841_v3, %v4684_v49 }
 0x201   : > { %v3042_v23 = vadd.f32 %v3034_v26, %v2712_v36  ;;  %v3044_v53 = vadd.f32 %v3036_v1, %v2714_v33  ;;  %v4357_v48 = vpack.c.bf16 %v4843_v19, %v4686_v34  ;;  %v4355_v52 = vpack.c.bf16 %v4829_v39, %v4676_v51  ;;  %v3385_v34 = vld [vmem:[%s5017_s4 + $0x8] sm:$0xff]  ;;  %v3386_v51 = vld [vmem:[%s5017_s4 + $0x10] sm:$0xff] }
 0x202   : > { %v3043_v58 = vadd.f32 %v3035_v24, %v2713_v63  ;;  %v3045_v59 = vadd.f32 %v3037_v41, %v2715_v30  ;;  %v3359_v30 = vmul.f32 %v3351_v47, %v4843_v19  ;;  %v4359_v49 = vpack.c.bf16 %v4831_v5, %v4678_v54  ;;  %v3387_v54 = vld [vmem:[%s5017_s4 + $0x18] sm:$0xff] }
 0x2bc   : > { %v3124_v31 = vpop.f32.mrb[32].mxu0  ;;  %v3195_v61 = vpop.f32.mrb[32].mxu1 }
 0x2bd   : > { %v3342_v45 = vmax.f32 %v3124_v31, 0.0  ;;  %v3344_v21 = vmax.f32 %v3195_v61, 0.0  ;;  %v3126_v44 = vpop.f32.mrb[33].mxu0  ;;  %v3197_v22 = vpop.f32.mrb[33].mxu1 }
 0x2be   : > { %v3343_v57 = vmax.f32 %v3126_v44, 0.0  ;;  %v3345_v35 = vmax.f32 %v3197_v22, 0.0 }
 0x2bf   : > { %v3360_v36 = vadd.f32 %v3352_v42, %v3342_v45  ;;  %v3362_v33 = vadd.f32 %v3354_v17, %v3344_v21 }
 0x2c0   : > { %v3361_v29 = vadd.f32 %v3353_v25, %v3343_v57  ;;  %v3363_v12 = vadd.f32 %v3355_v46, %v3345_v35  ;;  %v3266_v60 = vpop.f32.mrb[34].mxu0  ;;  %v3337_v63 = vpop.f32.mrb[34].mxu1 }
 0x2c1   : > { %v3368_v2 = vadd.f32 %v3360_v36, %v3038_v13  ;;  %v3370_v6 = vadd.f32 %v3362_v33, %v3040_v4  ;;  %v3346_v32 = vmax.f32 %v3266_v60, 0.0  ;;  %v3348_v40 = vmax.f32 %v3337_v63, 0.0  ;;  %v3268_v14 = vpop.f32.mrb[35].mxu0  ;;  %v3339_v28 = vpop.f32.mrb[35].mxu1 }
 0x2c2   : > { %v3347_v10 = vmax.f32 %v3268_v14, 0.0  ;;  %v3349_v37 = vmax.f32 %v3339_v28, 0.0  ;;  %v3369_v11 = vadd.f32 %v3361_v29, %v3039_v56  ;;  %v3371_v38 = vadd.f32 %v3363_v12, %v3041_v7 }
 0x2c3   : > { %v3364_v15 = vadd.f32 %v3356_v20, %v3346_v32  ;;  %v3366_v16 = vadd.f32 %v3358_v62, %v3348_v40 }
 0x2c4   : > { %v3365_v13 = vadd.f32 %v3357_v55, %v3347_v10  ;;  %v3367_v4 = vadd.f32 %v3359_v30, %v3349_v37  ;;  %3429 = vmatprep.subr.mxu0 %v3369_v11  ;;  %3518 = vmatprep.subr.mxu1 %v3371_v38 }
 0x2c5   : > { %v3372_v18 = vadd.f32 %v3364_v15, %v3042_v23  ;;  %v3374_v27 = vadd.f32 %v3366_v16, %v3044_v53  ;;  %3430 = vmatpush1.msra.mxu0 %v3368_v2  ;;  %3519 = vmatpush1.msra.mxu1 %v3370_v6 }
 0x2c6   : > { %4290 = vmatmul.mubr.msk.f32.vlgmr.msra.gmra.mrb[36].mxu0 %vm3412_vm1, %v3384_v43  ;;  %4354 = vmatprep.subr.bf16.mxu0 %v4353_v8  ;;  %v3373_v3 = vadd.f32 %v3365_v13, %v3043_v58  ;;  %v3375_v56 = vadd.f32 %v3367_v4, %v3045_v59 }
 0x2c7   : > { %4358 = vmatprep.subr.bf16.mxu1 %v4357_v48  ;;  %4294 = vmatmul.mubr.msk.f32.vlgmr.msra.gmra.mrb[36].mxu1 %vm3412_vm1, %v3384_v43 }
 0x2c8   : > { %4356 = vmatpush1.bf16.msra.mxu0 %v4355_v52  ;;  %4360 = vmatpush1.bf16.msra.mxu1 %v4359_v49 }
 0x2c9   : > { %3607 = vmatprep.subr.mxu0 %v3373_v3  ;;  %3696 = vmatprep.subr.mxu1 %v3375_v56 }
 0x2ca   : > { %3495 = vmatprep.mubr.f32.mxu0 %v5037_v0  ;;  %3584 = vmatprep.mubr.f32.mxu1 %v5037_v0 }
 0x2cb   : > { %4291 = vmatmul.mubr.msk.f32.gmra.mrb[38].mxu0 %vm3412_vm1, %v3385_v34  ;;  %4295 = vmatmul.mubr.msk.f32.gmra.mrb[38].mxu1 %vm3412_vm1, %v3385_v34 }
 0x2cc   : > { %3608 = vmatpush1.msra.mxu0 %v3372_v18  ;;  %3697 = vmatpush1.msra.mxu1 %v3374_v27 }
 0x2cd   : > { %3501 = vmatprep.mubr.f32.mxu0 %v5037_v0  ;;  %3590 = vmatprep.mubr.f32.mxu1 %v5037_v0 }
 0x2cf   : > { %4292 = vmatmul.mubr.msk.f32.gmra.mrb[40].mxu0 %vm3412_vm1, %v3386_v51  ;;  %4296 = vmatmul.mubr.msk.f32.gmra.mrb[40].mxu1 %vm3412_vm1, %v3386_v51 }
 0x2d0   : > { %3507 = vmatprep.mubr.f32.mxu0 %v5037_v0  ;;  %3596 = vmatprep.mubr.f32.mxu1 %v5037_v0 }
 0x2d3   : > { %4293 = vmatmul.mubr.msk.f32.gmra.mrb[42].mxu0 %vm3412_vm1, %v3387_v54  ;;  %4297 = vmatmul.mubr.msk.f32.gmra.mrb[42].mxu1 %vm3412_vm1, %v3387_v54 }
 0x2d4   : > { %3667 = vmatprep.mubr.f32.mxu0 %v5037_v0  ;;  %3756 = vmatprep.mubr.f32.mxu1 %v5037_v0 }
 0x2d7   : > { %4298 = vmatmul.mubr.msk.f32.vlgmr.msra.gmra.mrb[44].mxu0 %vm3412_vm1, %v3384_v43  ;;  %4302 = vmatmul.mubr.msk.f32.vlgmr.msra.gmra.mrb[44].mxu1 %vm3412_vm1, %v3384_v43 }
 0x2d8   : > { %3673 = vmatprep.mubr.f32.mxu0 %v5037_v0  ;;  %3762 = vmatprep.mubr.f32.mxu1 %v5037_v0 }
 0x2db   : > { %4299 = vmatmul.mubr.msk.f32.gmra.mrb[46].mxu0 %vm3412_vm1, %v3385_v34  ;;  %4303 = vmatmul.mubr.msk.f32.gmra.mrb[46].mxu1 %vm3412_vm1, %v3385_v34 }
 0x2dc   : > { %3679 = vmatprep.mubr.f32.mxu0 %v5037_v0  ;;  %3768 = vmatprep.mubr.f32.mxu1 %v5037_v0 }
 0x2df   : > { %4300 = vmatmul.mubr.msk.f32.gmra.mrb[48].mxu0 %vm3412_vm1, %v3386_v51  ;;  %4304 = vmatmul.mubr.msk.f32.gmra.mrb[48].mxu1 %vm3412_vm1, %v3386_v51 }
 0x2e0   : > { %3685 = vmatprep.mubr.f32.mxu0 %v5037_v0  ;;  %3774 = vmatprep.mubr.f32.mxu1 %v5037_v0 }
 0x2e3   : > { %4301 = vmatmul.mubr.msk.f32.gmra.mrb[50].mxu0 %vm3412_vm1, %v3387_v54  ;;  %4305 = vmatmul.mubr.msk.f32.gmra.mrb[50].mxu1 %vm3412_vm1, %v3387_v54 }
 0x399   : > { %v3491_v39 = vpop.f32.mrb[36].mxu0 }
 0x39a   : > { %v3934_v5 = vmul.f32 %v3491_v39, %v3491_v39  ;;  %v3493_v19 = vpop.f32.mrb[37].mxu0  ;;  %v3580_v7 = vpop.f32.mrb[36].mxu1 }
 0x39b   : > { %v4329_v9 = vpack.c.bf16 %v3493_v19, %v3491_v39  ;;  %v3893_v50 = vadd.f32 %v3493_v19, %v3491_v39  ;;  %v3935_v26 = vmul.f32 %v3493_v19, %v3493_v19  ;;  %v3936_v0 = vmul.f32 %v3580_v7, %v3580_v7  ;;  %v3582_v1 = vpop.f32.mrb[37].mxu1 }
 0x39c   : > { %v4330_v24 = vpack.c.bf16 %v3582_v1, %v3580_v7  ;;  %v3937_v53 = vmul.f32 %v3582_v1, %v3582_v1 }
 0x39d   : > { %3877 = vst [vmem:[%s4971_s20] sm:$0xff] %v4329_v9  ;;  %v3966_v41 = vadd.f32 %v3935_v26, %v3934_v5  ;;  %v3894_v23 = vadd.f32 %v3893_v50, %v3580_v7 }
 0x39e   : > { %v3497_v58 = vpop.f32.mrb[38].mxu0  ;;  %3878 = vst [vmem:[%s4971_s20 + $0x8] sm:$0xff] %v4330_v24  ;;  %v3586_v59 = vpop.f32.mrb[38].mxu1 }
 0x39f   : > { %v3967_v47 = vadd.f32 %v3966_v41, %v3936_v0  ;;  %v3942_v31 = vmul.f32 %v3497_v58, %v3497_v58  ;;  %v3499_v61 = vpop.f32.mrb[39].mxu0  ;;  %v3895_v45 = vadd.f32 %v3894_v23, %v3582_v1  ;;  %v3944_v42 = vmul.f32 %v3586_v59, %v3586_v59  ;;  %v3588_v21 = vpop.f32.mrb[39].mxu1 }
 0x3a0   : > { %v4333_v17 = vpack.c.bf16 %v3499_v61, %v3497_v58  ;;  %v3902_v44 = vadd.f32 %v3499_v61, %v3497_v58  ;;  %v3943_v22 = vmul.f32 %v3499_v61, %v3499_v61  ;;  %v4334_v57 = vpack.c.bf16 %v3588_v21, %v3586_v59 }
 0x3a1   : > { %v3968_v25 = vadd.f32 %v3967_v47, %v3937_v53  ;;  %v3945_v33 = vmul.f32 %v3588_v21, %v3588_v21 }
 0x3a2   : > { %3881 = vst [vmem:[%s4971_s20 + $0x20] sm:$0xff] %v4333_v17  ;;  %v3975_v35 = vadd.f32 %v3943_v22, %v3942_v31  ;;  %v3903_v46 = vadd.f32 %v3902_v44, %v3586_v59  ;;  %v3503_v36 = vpop.f32.mrb[40].mxu0  ;;  %3882 = vst [vmem:[%s4971_s20 + $0x28] sm:$0xff] %v4334_v57  ;;  %v3592_v20 = vpop.f32.mrb[40].mxu1 }
 0x3a3   : > { %v3950_v62 = vmul.f32 %v3503_v36, %v3503_v36  ;;  %v3505_v29 = vpop.f32.mrb[41].mxu0  ;;  %v3952_v12 = vmul.f32 %v3592_v20, %v3592_v20  ;;  %v3594_v60 = vpop.f32.mrb[41].mxu1 }
 0x3a4   : > { %v3976_v63 = vadd.f32 %v3975_v35, %v3944_v42  ;;  %v4337_v55 = vpack.c.bf16 %v3505_v29, %v3503_v36  ;;  %v3911_v30 = vadd.f32 %v3505_v29, %v3503_v36  ;;  %v3951_v2 = vmul.f32 %v3505_v29, %v3505_v29 }
 0x3a5   : > { %v3904_v6 = vadd.f32 %v3903_v46, %v3588_v21  ;;  %v4338_v32 = vpack.c.bf16 %v3594_v60, %v3592_v20  ;;  %v3953_v37 = vmul.f32 %v3594_v60, %v3594_v60 }
 0x3a6   : > { %3885 = vst [vmem:[%s4971_s20 + $0x40] sm:$0xff] %v4337_v55  ;;  %v3984_v40 = vadd.f32 %v3951_v2, %v3950_v62  ;;  %v3977_v14 = vadd.f32 %v3976_v63, %v3945_v33  ;;  %v3912_v28 = vadd.f32 %v3911_v30, %v3592_v20  ;;  %v3509_v10 = vpop.f32.mrb[42].mxu0  ;;  %v3598_v11 = vpop.f32.mrb[42].mxu1 }
 0x3a7   : > { %v3958_v38 = vmul.f32 %v3509_v10, %v3509_v10  ;;  %v3511_v15 = vpop.f32.mrb[43].mxu0  ;;  %3886 = vst [vmem:[%s4971_s20 + $0x48] sm:$0xff] %v4338_v32  ;;  %v3960_v16 = vmul.f32 %v3598_v11, %v3598_v11  ;;  %v3600_v43 = vpop.f32.mrb[43].mxu1 }
 0x3a8   : > { %v3985_v8 = vadd.f32 %v3984_v40, %v3952_v12  ;;  %v4341_v13 = vpack.c.bf16 %v3511_v15, %v3509_v10  ;;  %v3920_v4 = vadd.f32 %v3511_v15, %v3509_v10  ;;  %v3959_v48 = vmul.f32 %v3511_v15, %v3511_v15 }
 0x3a9   : > { %v3913_v18 = vadd.f32 %v3912_v28, %v3594_v60  ;;  %v4342_v27 = vpack.c.bf16 %v3600_v43, %v3598_v11  ;;  %v3961_v34 = vmul.f32 %v3600_v43, %v3600_v43 }
 0x3aa   : > { %3889 = vst [vmem:[%s4971_s20 + $0x60] sm:$0xff] %v4341_v13  ;;  %v3993_v52 = vadd.f32 %v3959_v48, %v3958_v38  ;;  %v3986_v49 = vadd.f32 %v3985_v8, %v3953_v37  ;;  %v3669_v3 = vpop.f32.mrb[44].mxu0  ;;  %v3921_v56 = vadd.f32 %v3920_v4, %v3598_v11  ;;  %v3758_v51 = vpop.f32.mrb[44].mxu1 }
 0x3ab   : > { %v3896_v54 = vadd.f32 %v3895_v45, %v3669_v3  ;;  %v3938_v39 = vmul.f32 %v3669_v3, %v3669_v3  ;;  %v3671_v5 = vpop.f32.mrb[45].mxu0  ;;  %3890 = vst [vmem:[%s4971_s20 + $0x68] sm:$0xff] %v4342_v27  ;;  %v3760_v19 = vpop.f32.mrb[45].mxu1  ;;  %v3940_v53 = vmul.f32 %v3758_v51, %v3758_v51 }
 0x3ac   : > { %v3994_v7 = vadd.f32 %v3993_v52, %v3960_v16  ;;  %v4331_v9 = vpack.c.bf16 %v3671_v5, %v3669_v3  ;;  %v3939_v50 = vmul.f32 %v3671_v5, %v3671_v5  ;;  %v3922_v26 = vadd.f32 %v3921_v56, %v3600_v43 }
 0x3ad   : > { %v3969_v0 = vadd.f32 %v3968_v25, %v3938_v39  ;;  %v3897_v1 = vadd.f32 %v3896_v54, %v3671_v5  ;;  %v4332_v24 = vpack.c.bf16 %v3760_v19, %v3758_v51  ;;  %v3941_v33 = vmul.f32 %v3760_v19, %v3760_v19 }
 0x3ae   : > { %3879 = vst [vmem:[%s4971_s20 + $0x10] sm:$0xff] %v4331_v9  ;;  %v3995_v41 = vadd.f32 %v3994_v7, %v3961_v34  ;;  %v3675_v23 = vpop.f32.mrb[46].mxu0  ;;  %v3764_v58 = vpop.f32.mrb[46].mxu1 }
 0x3af   : > { %v3905_v59 = vadd.f32 %v3904_v6, %v3675_v23  ;;  %v3946_v47 = vmul.f32 %v3675_v23, %v3675_v23  ;;  %v3677_v31 = vpop.f32.mrb[47].mxu0  ;;  %3880 = vst [vmem:[%s4971_s20 + $0x18] sm:$0xff] %v4332_v24  ;;  %v3898_v61 = vadd.f32 %v3897_v1, %v3758_v51  ;;  %v3766_v45 = vpop.f32.mrb[47].mxu1  ;;  %v3970_v44 = vadd.f32 %v3969_v0, %v3939_v50 }
 0x3b0   : > { %v4335_v42 = vpack.c.bf16 %v3677_v31, %v3675_v23  ;;  %v3947_v21 = vmul.f32 %v3677_v31, %v3677_v31  ;;  %v4336_v17 = vpack.c.bf16 %v3766_v45, %v3764_v58  ;;  %v3948_v25 = vmul.f32 %v3764_v58, %v3764_v58 }
 0x3b1   : > { %v3978_v22 = vadd.f32 %v3977_v14, %v3946_v47  ;;  %v3906_v57 = vadd.f32 %v3905_v59, %v3677_v31  ;;  %v3899_v35 = vadd.f32 %v3898_v61, %v3760_v19  ;;  %v3971_v20 = vadd.f32 %v3970_v44, %v3940_v53 }
 0x3b2   : > { %3883 = vst [vmem:[%s4971_s20 + $0x30] sm:$0xff] %v4335_v42  ;;  %v3681_v46 = vpop.f32.mrb[48].mxu0  ;;  %3884 = vst [vmem:[%s4971_s20 + $0x38] sm:$0xff] %v4336_v17  ;;  %v3770_v36 = vpop.f32.mrb[48].mxu1  ;;  %v3949_v6 = vmul.f32 %v3766_v45, %v3766_v45 }
 0x3b3   : > { %v3914_v62 = vadd.f32 %v3913_v18, %v3681_v46  ;;  %v3954_v29 = vmul.f32 %v3681_v46, %v3681_v46  ;;  %3900 = vadd.xlane.f32.xlu0 %v3899_v35  ;;  %v3683_v12 = vpop.f32.mrb[49].mxu0  ;;  %v3772_v60 = vpop.f32.mrb[49].mxu1  ;;  %v3979_v63 = vadd.f32 %v3978_v22, %v3947_v21  ;;  %v3972_v30 = vadd.f32 %v3971_v20, %v3941_v33 }
 0x3b4   : > { %v4339_v55 = vpack.c.bf16 %v3683_v12, %v3681_v46  ;;  %v4340_v2 = vpack.c.bf16 %v3772_v60, %v3770_v36  ;;  %v3907_v28 = vadd.f32 %v3906_v57, %v3764_v58  ;;  %v3955_v10 = vmul.f32 %v3683_v12, %v3683_v12 }
 0x3b5   : > { %v3987_v32 = vadd.f32 %v3986_v49, %v3954_v29  ;;  %v3915_v40 = vadd.f32 %v3914_v62, %v3683_v12  ;;  %v3980_v14 = vadd.f32 %v3979_v63, %v3948_v25  ;;  %v3956_v16 = vmul.f32 %v3770_v36, %v3770_v36 }
 0x3b6   : > { %3887 = vst [vmem:[%s4971_s20 + $0x50] sm:$0xff] %v4339_v55  ;;  %v3687_v37 = vpop.f32.mrb[50].mxu0  ;;  %3888 = vst [vmem:[%s4971_s20 + $0x58] sm:$0xff] %v4340_v2  ;;  %v3776_v11 = vpop.f32.mrb[50].mxu1  ;;  %v3908_v18 = vadd.f32 %v3907_v28, %v3766_v45  ;;  %v3957_v34 = vmul.f32 %v3772_v60, %v3772_v60 }
 0x3b7   : > { %v3923_v38 = vadd.f32 %v3922_v26, %v3687_v37  ;;  %v3962_v15 = vmul.f32 %v3687_v37, %v3687_v37  ;;  %3973 = vadd.xlane.f32.xlu0 %v3972_v30  ;;  %v3689_v43 = vpop.f32.mrb[51].mxu0  ;;  %v3981_v8 = vadd.f32 %v3980_v14, %v3949_v6  ;;  %v3778_v13 = vpop.f32.mrb[51].mxu1  ;;  %v3964_v3 = vmul.f32 %v3776_v11, %v3776_v11 }
 0x3b8   : > { %v4343_v4 = vpack.c.bf16 %v3689_v43, %v3687_v37  ;;  %v3963_v48 = vmul.f32 %v3689_v43, %v3689_v43  ;;  %v4344_v27 = vpack.c.bf16 %v3778_v13, %v3776_v11  ;;  %v3916_v56 = vadd.f32 %v3915_v40, %v3770_v36 }
 0x3b9   : > { %v3996_v52 = vadd.f32 %v3995_v41, %v3962_v15  ;;  %v3924_v49 = vadd.f32 %v3923_v38, %v3689_v43  ;;  %3982 = vadd.xlane.f32.xlu1 %v3981_v8  ;;  %v3988_v51 = vadd.f32 %v3987_v32, %v3955_v10  ;;  %v3965_v39 = vmul.f32 %v3778_v13, %v3778_v13 }
 0x3ba   : > { %3891 = vst [vmem:[%s4971_s20 + $0x70] sm:$0xff] %v4343_v4  ;;  %3892 = vst [vmem:[%s4971_s20 + $0x78] sm:$0xff] %v4344_v27  ;;  %v3917_v5 = vadd.f32 %v3916_v56, %v3772_v60 }
 0x3bb   : > { %v3997_v54 = vadd.f32 %v3996_v52, %v3963_v48  ;;  %3909 = vadd.xlane.f32.xlu0 %v3908_v18  ;;  %v3925_v19 = vadd.f32 %v3924_v49, %v3776_v11  ;;  %v3989_v7 = vadd.f32 %v3988_v51, %v3956_v16 }
 0x3bd   : > { %3918 = vadd.xlane.f32.xlu1 %v3917_v5  ;;  %v3926_v9 = vadd.f32 %v3925_v19, %v3778_v13  ;;  %v3998_v50 = vadd.f32 %v3997_v54, %v3964_v3  ;;  %v3990_v26 = vadd.f32 %v3989_v7, %v3957_v34 }
 0x3bf   : > { %v3999_v0 = vadd.f32 %v3998_v50, %v3965_v39  ;;  %3991 = vadd.xlane.f32.xlu0 %v3990_v26 }
 0x3c1   : > { %3927 = vadd.xlane.f32.xlu1 %v3926_v9 }
 0x3c5   : > { %4000 = vadd.xlane.f32.xlu1 %v3999_v0 }
 0x440   : > { %v3901_v1 = vpop.xlane.xlu0 %3900 }
 0x441   : > { %3930 = vst.msk [vmem:[%s403_s27] sm:$0xff] %vm3929_vm2, %v3901_v1 }
 0x444   : > { %v3974_v24 = vpop.xlane.xlu0 %3973 }
 0x445   : > { %4002 = vst.msk [vmem:[%s412_s8] sm:$0xff] %vm3929_vm2, %v3974_v24 }
 0x446   : > { %v3983_v41 = vpop.xlane.xlu1 %3982 }
 0x447   : > { %4003 = vst.msk [vmem:[%s412_s8 + $0x8] sm:$0xff] %vm3929_vm2, %v3983_v41 }
 0x448   : > { %v3910_v23 = vpop.xlane.xlu0 %3909 }
 0x449   : > { %3931 = vst.msk [vmem:[%s403_s27 + $0x8] sm:$0xff] %vm3929_vm2, %v3910_v23 }
 0x44a   : > { %v3919_v53 = vpop.xlane.xlu1 %3918 }
 0x44b   : > { %3932 = vst.msk [vmem:[%s403_s27 + $0x10] sm:$0xff] %vm3929_vm2, %v3919_v53 }
 0x44c   : > { %v3992_v58 = vpop.xlane.xlu0 %3991 }
 0x44d   : > { %4004 = vst.msk [vmem:[%s412_s8 + $0x10] sm:$0xff] %vm3929_vm2, %v3992_v58 }
 0x44e   : > { %v3928_v59 = vpop.xlane.xlu1 %3927 }
 0x44f   : > { %3933 = vst.msk [vmem:[%s403_s27 + $0x18] sm:$0xff] %vm3929_vm2, %v3928_v59 }
 0x452   : > { %v4001_v47 = vpop.xlane.xlu1 %4000 }
 0x453   : > { %4005 = vst.msk [vmem:[%s412_s8 + $0x18] sm:$0xff] %vm3929_vm2, %v4001_v47 }
 0x454 PF: > { %s19_s26 = sadd.s32 1, %s4438_s26   ;;  %s5044_s24 = smov %s4434_s25 }
 0x455   : > { %p16_p2 = scmp.ge.s32.totalorder %s19_s26, 4   ;;  %s5045_s25 = smov %s5047_s28 }
 0x457   :  { %18 = sbr.rel (!%p16_p2) target bundleno = 2 (0x2), region = 102 }
 0x45e   :  { %4084 = vsyncpa [#allocation4], 1 }
 0x45f   :  { %4086 = vsyncpa [#allocation4 + $0x1], 1 }

</bundles_post_ra>
